<compile_context>
chip_gen: v7x
topology: tpu7x:2x2x1
jax: 0.10.0
libtpu: 0.0.40
codegen_flags: <defaults>
</compile_context>

<pallas_src>
import numpy as np
import jax
import jax.numpy as jnp
from jax import lax
from jax.experimental import pallas as pl
from jax.experimental.pallas import tpu as pltpu

BN_EPS = 1e-5


# --------------------------------------------------------------------------
# helpers
# --------------------------------------------------------------------------
def _shift_lanes(a, delta):
    """result[:, i] = a[:, i + delta], zero-filled where i + delta is out of range."""
    if delta == 0:
        return a
    rows, cols = a.shape
    if delta > 0:
        pad = jnp.zeros((rows, delta), a.dtype)
        return jnp.concatenate([a[:, delta:], pad], axis=1)
    d = -delta
    pad = jnp.zeros((rows, d), a.dtype)
    return jnp.concatenate([pad, a[:, : cols - d]], axis=1)


def _fold_bn(sum_c, ssq_c, gamma, beta, count):
    """Fold training-mode BN into a per-channel scale/shift: y*scale + shift."""
    mean = sum_c / count
    var = jnp.maximum(ssq_c / count - mean * mean, 0.0)   # biased var, clamped >= 0
    scale = gamma * lax.rsqrt(var + BN_EPS)
    shift = beta - mean * scale
    return (scale.reshape(-1, 1).astype(jnp.float32),
            shift.reshape(-1, 1).astype(jnp.float32))


def _pick_tile(sp, cap=8192):
    """Largest divisor of sp that is a multiple of 128 and <= cap, else sp."""
    for t in range(min(sp, cap), 127, -1):
        if sp % t == 0 and t % 128 == 0:
            return t
    return sp


def _vmem_limit_bytes():
    # Derive the scoped-VMEM cap from the actual chip (64 MiB on v7x,
    # 128 MiB on v5e/v6e); fall back to the compiler default if unavailable.
    try:
        cap = int(pltpu.get_tpu_info().vmem_capacity_bytes)
        return min(96 * 1024 * 1024, (cap * 3) // 4)
    except Exception:
        return None


# --------------------------------------------------------------------------
# Pass 1: depthwise 3x3x3 conv on (D, H*W) tiles + BN1 partial stats.
# --------------------------------------------------------------------------
def make_dw_kernel(H, W):
    S = H * W

    def dw_kernel(x_ref, w_ref, wm_ref, ydw_ref, s_ref, q_ref):
        # x_ref:  (1, 1, D, S) f32    one (sample, channel) volume, (h,w) fused in lanes
        # w_ref:  (1, 1, 27)   f32    the 27 taps of this channel
        # wm_ref: (2, S)       f32    w-boundary validity masks (dw=+1 row 0, dw=-1 row 1)
        # ydw_ref: (1, 1, D, S) bf16  conv output (NCDHW-flattened layout)
        # s_ref/q_ref: (1,1,1,1) f32  per-(n,c) channel sum / sum of squares
        x = x_ref[0, 0]                                   # (D, S) f32
        D = x.shape[0]
        w_row = w_ref[0]                                  # (1, 27) f32

        zero_row = jnp.zeros((1, S), jnp.float32)
        planes = {
            -1: jnp.concatenate([zero_row, x[: D - 1, :]], axis=0),
            0: x,
            1: jnp.concatenate([x[1:, :], zero_row], axis=0),
        }
        # Row-wrap across the fused (h*W + w) axis is killed by these masks;
        # depth / height overflow is killed by the zero-filled shifts.
        wmask = {1: wm_ref[0:1, :], -1: wm_ref[1:2, :], 0: None}

        acc = jnp.zeros((D, S), jnp.float32)
        for dd in (-1, 0, 1):
            xp = planes[dd]
            for dh in (-1, 0, 1):
                for dw in (-1, 0, 1):
                    k = ((dd + 1) * 3 + (dh + 1)) * 3 + (dw + 1)
                    tap = w_row[0:1, k:k + 1]             # (1, 1), broadcast multiply
                    v = _shift_lanes(xp, dh * W + dw)
                    m = wmask[dw]
                    if m is None:
                        acc = acc + v * tap
                    else:
                        acc = acc + v * (m * tap)

        yb = acc.astype(ydw_ref.dtype)
        ydw_ref[0, 0] = yb
        # BN1 partial stats from the SAME bf16 values passes 2/3 will read.
        yf = yb.astype(jnp.float32)
        s_ref[0, 0] = jnp.sum(yf, axis=(0, 1), keepdims=True)
        q_ref[0, 0] = jnp.sum(yf * yf, axis=(0, 1), keepdims=True)

    return dw_kernel


# --------------------------------------------------------------------------
# Pass 2: BN1(scale/shift)+ReLU and BN2 stats via a Cin x Cin Gram matrix.
# --------------------------------------------------------------------------
def pw_stats_kernel(ydw_ref, s1_ref, t1_ref, sh_ref, g_ref):
    # ydw_ref: (1, Cin, TM) bf16 ; s1/t1: (Cin, 1) f32
    h = jnp.maximum(ydw_ref[0].astype(jnp.float32) * s1_ref[...] + t1_ref[...], 0.0)
    hb = h.astype(jnp.bfloat16)
    sh_ref[0, 0] = jnp.sum(hb.astype(jnp.float32), axis=1, keepdims=True)   # (Cin, 1)
    # G[i, k] = sum_m hb[i, m] * hb[k, m]  (same bf16 h that pass 3 feeds the MXU)
    g_ref[0, 0] = lax.dot_general(hb, hb, (((1,), (1,)), ((), ())),
                                  preferred_element_type=jnp.float32)       # (Cin, Cin)


# --------------------------------------------------------------------------
# Pass 3: BN1+ReLU -> 1x1x1 conv (transposed: output channels in sublanes)
#         -> BN2+ReLU, written directly in NCDHW layout.
# --------------------------------------------------------------------------
def pw_out_kernel(ydw_ref, s1_ref, t1_ref, wt_ref, s2_ref, t2_ref, o_ref):
    h = jnp.maximum(ydw_ref[0].astype(jnp.float32) * s1_ref[...] + t1_ref[...], 0.0)
    y = jnp.dot(wt_ref[...], h.astype(jnp.bfloat16),
                preferred_element_type=jnp.float32)       # (Cout, TM) f32
    o_ref[0] = jnp.maximum(y * s2_ref[...] + t2_ref[...], 0.0).astype(o_ref.dtype)


# --------------------------------------------------------------------------
# Wrapper
# --------------------------------------------------------------------------
def mobilenet3d_block(x_ncdhw, params):
    """Forward pass of Block (stride=1). Input/output in PyTorch NCDHW layout."""
    # TODO(synk): stride > 1 depthwise variant is not implemented (module default is 1).
    w_dw = params["w_dw"].astype(jnp.float32)        # (Cin, 27) depthwise taps
    w_pw_t = params["w_pw_t"].astype(jnp.bfloat16)   # (Cout, Cin) pointwise weight
    g1 = params["gamma1"].astype(jnp.float32)
    b1 = params["beta1"].astype(jnp.float32)
    g2 = params["gamma2"].astype(jnp.float32)
    b2 = params["beta2"].astype(jnp.float32)

    N, Cin, D, H, W = x_ncdhw.shape
    Cout = w_pw_t.shape[0]
    S = H * W
    SP = D * S
    M = N * SP

    # Input stays NCDHW; only free contiguous-minor-dim merges, no HBM transpose.
    x = x_ncdhw.reshape(N, Cin, D, S).astype(jnp.float32)
    w_dw3 = w_dw.reshape(Cin, 1, 27)

    # w-boundary validity masks for the fused (h*W + w) lane axis.
    wi = np.arange(S) % W
    masks = jnp.asarray(np.stack([(wi <= W - 2).astype(np.float32),   # valid for dw = +1
                                  (wi >= 1).astype(np.float32)]))     # valid for dw = -1

    vlim = _vmem_limit_bytes()
    cparams = pltpu.CompilerParams(
        dimension_semantics=("parallel", "parallel"), vmem_limit_bytes=vlim)

    # ------------------ Pass 1: depthwise conv + BN1 partial stats ------------------
    # TODO(synk): for very large D*H*W this single-(n,c) tile should be split along D.
    ydw4, s1p, q1p = pl.pallas_call(
        make_dw_kernel(H, W),
        out_shape=(jax.ShapeDtypeStruct((N, Cin, D, S), jnp.bfloat16),
                   jax.ShapeDtypeStruct((N, Cin, 1, 1), jnp.float32),
                   jax.ShapeDtypeStruct((N, Cin, 1, 1), jnp.float32)),
        grid_spec=pltpu.PrefetchScalarGridSpec(
            num_scalar_prefetch=0,
            grid=(N, Cin),
            in_specs=[pl.BlockSpec((1, 1, D, S), lambda n, c: (n, c, 0, 0)),
                      pl.BlockSpec((1, 1, 27), lambda n, c: (c, 0, 0)),
                      pl.BlockSpec((2, S), lambda n, c: (0, 0))],
            out_specs=[pl.BlockSpec((1, 1, D, S), lambda n, c: (n, c, 0, 0)),
                       pl.BlockSpec((1, 1, 1, 1), lambda n, c: (n, c, 0, 0)),
                       pl.BlockSpec((1, 1, 1, 1), lambda n, c: (n, c, 0, 0))]),
        compiler_params=cparams,
    )(x, w_dw3, masks)

    scale1, shift1 = _fold_bn(jnp.sum(s1p, axis=(0, 2, 3)),
                              jnp.sum(q1p, axis=(0, 2, 3)), g1, b1, float(M))

    # ------------------ Pass 2: BN2 stats via Cin x Cin Gram ------------------------
    ydw = ydw4.reshape(N, Cin, SP)                    # NCDHW-flattened, free reshape
    TM = _pick_tile(SP)
    NT = SP // TM

    row_in = pl.BlockSpec((1, Cin, TM), lambda n, m: (n, 0, m))
    cin_vec = pl.BlockSpec((Cin, 1), lambda n, m: (0, 0))

    shp, gp = pl.pallas_call(
        pw_stats_kernel,
        out_shape=(jax.ShapeDtypeStruct((N, NT, Cin, 1), jnp.float32),
                   jax.ShapeDtypeStruct((N, NT, Cin, Cin), jnp.float32)),
        grid_spec=pltpu.PrefetchScalarGridSpec(
            num_scalar_prefetch=0,
            grid=(N, NT),
            in_specs=[row_in, cin_vec, cin_vec],
            out_specs=[pl.BlockSpec((1, 1, Cin, 1), lambda n, m: (n, m, 0, 0)),
                       pl.BlockSpec((1, 1, Cin, Cin), lambda n, m: (n, m, 0, 0))]),
        compiler_params=cparams,
    )(ydw, scale1, shift1)

    # BN2 stats from the same bf16-rounded weights/activations pass 3 uses.
    wtb = w_pw_t.astype(jnp.float32)                  # (Cout, Cin), bf16-rounded
    sum_h = jnp.sum(shp, axis=(0, 1))[:, 0]           # (Cin,)
    gram = jnp.sum(gp, axis=(0, 1))                   # (Cin, Cin)
    sum_y = wtb @ sum_h                               # (Cout,)
    ssq_y = jnp.einsum('oi,ik,ok->o', wtb, gram, wtb) # diag(W G W^T)
    scale2, shift2 = _fold_bn(sum_y, ssq_y, g2, b2, float(M))

    # ------------------ Pass 3: normalize + 1x1x1 conv + BN2 + ReLU -----------------
    cout_vec = pl.BlockSpec((Cout, 1), lambda n, m: (0, 0))
    out_flat = pl.pallas_call(
        pw_out_kernel,
        out_shape=jax.ShapeDtypeStruct((N, Cout, SP), jnp.float32),
        grid_spec=pltpu.PrefetchScalarGridSpec(
            num_scalar_prefetch=0,
            grid=(N, NT),
            in_specs=[row_in, cin_vec, cin_vec,
                      pl.BlockSpec((Cout, Cin), lambda n, m: (0, 0)),
                      cout_vec, cout_vec],
            out_specs=pl.BlockSpec((1, Cout, TM), lambda n, m: (n, 0, m))),
        compiler_params=cparams,
    )(ydw, scale1, shift1, w_pw_t, scale2, shift2)

    return out_flat.reshape(N, Cout, D, H, W)         # already NCDHW; free reshape


# ---------------- pure-JAX reference (PyTorch semantics, NCDHW) ----------------
def reference_block(x, w_dw_oidhw, w_pw_oidhw, g1, b1, g2, b2):
    def bn_relu_train(y, gamma, beta):
        mean = jnp.mean(y, axis=(0, 2, 3, 4), keepdims=True)
        var = jnp.mean((y - mean) ** 2, axis=(0, 2, 3, 4), keepdims=True)
        yn = (y - mean) / jnp.sqrt(var + BN_EPS)
        yn = yn * gamma.reshape(1, -1, 1, 1, 1) + beta.reshape(1, -1, 1, 1, 1)
        return jnp.maximum(yn, 0.0)

    Cin = x.shape[1]
    dn1 = lax.conv_dimension_numbers(x.shape, w_dw_oidhw.shape,
                                     ('NCDHW', 'OIDHW', 'NCDHW'))
    y = lax.conv_general_dilated(x, w_dw_oidhw, (1, 1, 1), [(1, 1)] * 3,
                                 dimension_numbers=dn1, feature_group_count=Cin,
                                 precision=lax.Precision.HIGHEST)
    y = bn_relu_train(y, g1, b1)
    dn2 = lax.conv_dimension_numbers(y.shape, w_pw_oidhw.shape,
                                     ('NCDHW', 'OIDHW', 'NCDHW'))
    y = lax.conv_general_dilated(y, w_pw_oidhw, (1, 1, 1), [(0, 0)] * 3,
                                 dimension_numbers=dn2,
                                 precision=lax.Precision.HIGHEST)
    return bn_relu_train(y, g2, b2)


if __name__ == "__main__":
    key = jax.random.PRNGKey(0)
    k_x, k_dw, k_pw, k_g1, k_b1, k_g2, k_b2 = jax.random.split(key, 7)

    N, Cin, Cout, D, H, W = 2, 8, 16, 8, 8, 8
    x = jax.random.normal(k_x, (N, Cin, D, H, W), jnp.float32)

    # Deterministic params in PyTorch layouts, then repacked for the kernels.
    w_dw_torch = jax.random.normal(k_dw, (Cin, 1, 3, 3, 3), jnp.float32) * 0.2
    w_pw_torch = jax.random.normal(k_pw, (Cout, Cin, 1, 1, 1), jnp.float32) * 0.2
    gamma1 = jax.random.uniform(k_g1, (Cin,), jnp.float32, 0.5, 1.5)
    beta1 = jax.random.normal(k_b1, (Cin,), jnp.float32) * 0.1
    gamma2 = jax.random.uniform(k_g2, (Cout,), jnp.float32, 0.5, 1.5)
    beta2 = jax.random.normal(k_b2, (Cout,), jnp.float32) * 0.1

    params = {
        # (Cin,1,3,3,3) -> (Cin, 27), row order (kd, kh, kw)
        "w_dw": w_dw_torch.reshape(Cin, 27),
        # (Cout,Cin,1,1,1) -> (Cout, Cin)
        "w_pw_t": w_pw_torch[:, :, 0, 0, 0],
        "gamma1": gamma1, "beta1": beta1,
        "gamma2": gamma2, "beta2": beta2,
    }

    out = jax.jit(mobilenet3d_block)(x, params)
    out = jax.block_until_ready(out)

    ref = reference_block(x, w_dw_torch, w_pw_torch, gamma1, beta1, gamma2, beta2)
    # bf16 activation storage + bf16 MXU operands vs the f32 HIGHEST reference.
    np.testing.assert_allclose(np.asarray(out), np.asarray(ref),
                               rtol=3e-2, atol=3e-2)
    print("KERNEL_OK")
</pallas_src>

<mosaic_0001>
module attributes {stable_mosaic.version = 11 : i64} {
  func.func @dw_kernel(%arg0: i32, %arg1: i32, %arg2: memref<1x1x8x64xf32, #tpu.memory_space<vmem>>, %arg3: memref<1x1x27xf32, #tpu.memory_space<vmem>>, %arg4: memref<2x64xf32, #tpu.memory_space<vmem>>, %arg5: memref<1x1x8x64xbf16, #tpu.memory_space<vmem>>, %arg6: memref<1x1x1x1xf32, #tpu.memory_space<vmem>>, %arg7: memref<1x1x1x1xf32, #tpu.memory_space<vmem>>) attributes {dimension_semantics = [#tpu.dimension_semantics<parallel>, #tpu.dimension_semantics<parallel>], iteration_bounds = array<i64: 2, 8>, scalar_prefetch = 0 : i64, scratch_operands = 0 : i64, tpu.core_type = #tpu.core_type<tc>, window_params = [{transform_indices = @transform_0, window_bounds = array<i64: 1, 1, 8, 64>}, {transform_indices = @transform_1, window_bounds = array<i64: 1, 1, 27>}, {pipeline_mode = #tpu.pipeline_mode<synchronous>, transform_indices = @transform_2, window_bounds = array<i64: 2, 64>}, {transform_indices = @transform_3, window_bounds = array<i64: 1, 1, 8, 64>}, {transform_indices = @transform_4, window_bounds = array<i64: 1, 1, 1, 1>}, {transform_indices = @transform_5, window_bounds = array<i64: 1, 1, 1, 1>}]} {
    %c0 = arith.constant 0 : index
    %c0_0 = arith.constant 0 : index
    %c0_1 = arith.constant 0 : index
    %c0_2 = arith.constant 0 : index
    %0 = vector.load %arg2[%c0, %c0_0, %c0_1, %c0_2] : memref<1x1x8x64xf32, #tpu.memory_space<vmem>>, vector<1x1x8x64xf32>
    %1 = vector.shape_cast %0 : vector<1x1x8x64xf32> to vector<8x64xf32>
    %c0_3 = arith.constant 0 : index
    %c0_4 = arith.constant 0 : index
    %c0_5 = arith.constant 0 : index
    %2 = vector.load %arg3[%c0_3, %c0_4, %c0_5] : memref<1x1x27xf32, #tpu.memory_space<vmem>>, vector<1x1x27xf32>
    %3 = vector.shape_cast %2 : vector<1x1x27xf32> to vector<1x27xf32>
    %cst = arith.constant 0.000000e+00 : f32
    %4 = vector.broadcast %cst : f32 to vector<1x64xf32>
    %5 = vector.extract_strided_slice %1 {offsets = [0, 0], sizes = [7, 64], strides = [1, 1]} : vector<8x64xf32> to vector<7x64xf32>
    %6 = tpu.concatenate %4, %5 in 0 : vector<1x64xf32>, vector<7x64xf32> -> vector<8x64xf32>
    %7 = vector.extract_strided_slice %1 {offsets = [1, 0], sizes = [7, 64], strides = [1, 1]} : vector<8x64xf32> to vector<7x64xf32>
    %8 = tpu.concatenate %7, %4 in 0 : vector<7x64xf32>, vector<1x64xf32> -> vector<8x64xf32>
    %c0_6 = arith.constant 0 : index
    %c0_7 = arith.constant 0 : index
    %9 = vector.load %arg4[%c0_6, %c0_7] : memref<2x64xf32, #tpu.memory_space<vmem>>, vector<1x64xf32>
    %c1 = arith.constant 1 : index
    %c0_8 = arith.constant 0 : index
    %10 = vector.load %arg4[%c1, %c0_8] : memref<2x64xf32, #tpu.memory_space<vmem>>, vector<1x64xf32>
    %cst_9 = arith.constant 0.000000e+00 : f32
    %11 = vector.broadcast %cst_9 : f32 to vector<8x64xf32>
    %12 = vector.extract_strided_slice %3 {offsets = [0, 0], sizes = [1, 1], strides = [1, 1]} : vector<1x27xf32> to vector<1x1xf32>
    %cst_10 = arith.constant 0.000000e+00 : f32
    %13 = vector.broadcast %cst_10 : f32 to vector<8x9xf32>
    %14 = vector.extract_strided_slice %6 {offsets = [0, 0], sizes = [8, 55], strides = [1, 1]} : vector<8x64xf32> to vector<8x55xf32>
    %15 = tpu.concatenate %13, %14 in 1 : vector<8x9xf32>, vector<8x55xf32> -> vector<8x64xf32>
    %16 = vector.broadcast %12 : vector<1x1xf32> to vector<1x64xf32>
    %17 = arith.mulf %10, %16 : vector<1x64xf32>
    %18 = vector.broadcast %17 : vector<1x64xf32> to vector<8x64xf32>
    %19 = arith.mulf %15, %18 : vector<8x64xf32>
    %20 = arith.addf %11, %19 : vector<8x64xf32>
    %21 = vector.extract_strided_slice %3 {offsets = [0, 1], sizes = [1, 1], strides = [1, 1]} : vector<1x27xf32> to vector<1x1xf32>
    %cst_11 = arith.constant 0.000000e+00 : f32
    %22 = vector.broadcast %cst_11 : f32 to vector<8x8xf32>
    %23 = vector.extract_strided_slice %6 {offsets = [0, 0], sizes = [8, 56], strides = [1, 1]} : vector<8x64xf32> to vector<8x56xf32>
    %24 = tpu.concatenate %22, %23 in 1 : vector<8x8xf32>, vector<8x56xf32> -> vector<8x64xf32>
    %25 = vector.broadcast %21 : vector<1x1xf32> to vector<8x64xf32>
    %26 = arith.mulf %24, %25 : vector<8x64xf32>
    %27 = arith.addf %20, %26 : vector<8x64xf32>
    %28 = vector.extract_strided_slice %3 {offsets = [0, 2], sizes = [1, 1], strides = [1, 1]} : vector<1x27xf32> to vector<1x1xf32>
    %cst_12 = arith.constant 0.000000e+00 : f32
    %29 = vector.broadcast %cst_12 : f32 to vector<8x7xf32>
    %30 = vector.extract_strided_slice %6 {offsets = [0, 0], sizes = [8, 57], strides = [1, 1]} : vector<8x64xf32> to vector<8x57xf32>
    %31 = tpu.concatenate %29, %30 in 1 : vector<8x7xf32>, vector<8x57xf32> -> vector<8x64xf32>
    %32 = vector.broadcast %28 : vector<1x1xf32> to vector<1x64xf32>
    %33 = arith.mulf %9, %32 : vector<1x64xf32>
    %34 = vector.broadcast %33 : vector<1x64xf32> to vector<8x64xf32>
    %35 = arith.mulf %31, %34 : vector<8x64xf32>
    %36 = arith.addf %27, %35 : vector<8x64xf32>
    %37 = vector.extract_strided_slice %3 {offsets = [0, 3], sizes = [1, 1], strides = [1, 1]} : vector<1x27xf32> to vector<1x1xf32>
    %cst_13 = arith.constant 0.000000e+00 : f32
    %38 = vector.broadcast %cst_13 : f32 to vector<8x1xf32>
    %39 = vector.extract_strided_slice %6 {offsets = [0, 0], sizes = [8, 63], strides = [1, 1]} : vector<8x64xf32> to vector<8x63xf32>
    %40 = tpu.concatenate %38, %39 in 1 : vector<8x1xf32>, vector<8x63xf32> -> vector<8x64xf32>
    %41 = vector.broadcast %37 : vector<1x1xf32> to vector<1x64xf32>
    %42 = arith.mulf %10, %41 : vector<1x64xf32>
    %43 = vector.broadcast %42 : vector<1x64xf32> to vector<8x64xf32>
    %44 = arith.mulf %40, %43 : vector<8x64xf32>
    %45 = arith.addf %36, %44 : vector<8x64xf32>
    %46 = vector.extract_strided_slice %3 {offsets = [0, 4], sizes = [1, 1], strides = [1, 1]} : vector<1x27xf32> to vector<1x1xf32>
    %47 = vector.broadcast %46 : vector<1x1xf32> to vector<8x64xf32>
    %48 = arith.mulf %6, %47 : vector<8x64xf32>
    %49 = arith.addf %45, %48 : vector<8x64xf32>
    %50 = vector.extract_strided_slice %3 {offsets = [0, 5], sizes = [1, 1], strides = [1, 1]} : vector<1x27xf32> to vector<1x1xf32>
    %cst_14 = arith.constant 0.000000e+00 : f32
    %51 = vector.broadcast %cst_14 : f32 to vector<8x1xf32>
    %52 = vector.extract_strided_slice %6 {offsets = [0, 1], sizes = [8, 63], strides = [1, 1]} : vector<8x64xf32> to vector<8x63xf32>
    %53 = tpu.concatenate %52, %51 in 1 : vector<8x63xf32>, vector<8x1xf32> -> vector<8x64xf32>
    %54 = vector.broadcast %50 : vector<1x1xf32> to vector<1x64xf32>
    %55 = arith.mulf %9, %54 : vector<1x64xf32>
    %56 = vector.broadcast %55 : vector<1x64xf32> to vector<8x64xf32>
    %57 = arith.mulf %53, %56 : vector<8x64xf32>
    %58 = arith.addf %49, %57 : vector<8x64xf32>
    %59 = vector.extract_strided_slice %3 {offsets = [0, 6], sizes = [1, 1], strides = [1, 1]} : vector<1x27xf32> to vector<1x1xf32>
    %cst_15 = arith.constant 0.000000e+00 : f32
    %60 = vector.broadcast %cst_15 : f32 to vector<8x7xf32>
    %61 = vector.extract_strided_slice %6 {offsets = [0, 7], sizes = [8, 57], strides = [1, 1]} : vector<8x64xf32> to vector<8x57xf32>
    %62 = tpu.concatenate %61, %60 in 1 : vector<8x57xf32>, vector<8x7xf32> -> vector<8x64xf32>
    %63 = vector.broadcast %59 : vector<1x1xf32> to vector<1x64xf32>
    %64 = arith.mulf %10, %63 : vector<1x64xf32>
    %65 = vector.broadcast %64 : vector<1x64xf32> to vector<8x64xf32>
    %66 = arith.mulf %62, %65 : vector<8x64xf32>
    %67 = arith.addf %58, %66 : vector<8x64xf32>
    %68 = vector.extract_strided_slice %3 {offsets = [0, 7], sizes = [1, 1], strides = [1, 1]} : vector<1x27xf32> to vector<1x1xf32>
    %cst_16 = arith.constant 0.000000e+00 : f32
    %69 = vector.broadcast %cst_16 : f32 to vector<8x8xf32>
    %70 = vector.extract_strided_slice %6 {offsets = [0, 8], sizes = [8, 56], strides = [1, 1]} : vector<8x64xf32> to vector<8x56xf32>
    %71 = tpu.concatenate %70, %69 in 1 : vector<8x56xf32>, vector<8x8xf32> -> vector<8x64xf32>
    %72 = vector.broadcast %68 : vector<1x1xf32> to vector<8x64xf32>
    %73 = arith.mulf %71, %72 : vector<8x64xf32>
    %74 = arith.addf %67, %73 : vector<8x64xf32>
    %75 = vector.extract_strided_slice %3 {offsets = [0, 8], sizes = [1, 1], strides = [1, 1]} : vector<1x27xf32> to vector<1x1xf32>
    %cst_17 = arith.constant 0.000000e+00 : f32
    %76 = vector.broadcast %cst_17 : f32 to vector<8x9xf32>
    %77 = vector.extract_strided_slice %6 {offsets = [0, 9], sizes = [8, 55], strides = [1, 1]} : vector<8x64xf32> to vector<8x55xf32>
    %78 = tpu.concatenate %77, %76 in 1 : vector<8x55xf32>, vector<8x9xf32> -> vector<8x64xf32>
    %79 = vector.broadcast %75 : vector<1x1xf32> to vector<1x64xf32>
    %80 = arith.mulf %9, %79 : vector<1x64xf32>
    %81 = vector.broadcast %80 : vector<1x64xf32> to vector<8x64xf32>
    %82 = arith.mulf %78, %81 : vector<8x64xf32>
    %83 = arith.addf %74, %82 : vector<8x64xf32>
    %84 = vector.extract_strided_slice %3 {offsets = [0, 9], sizes = [1, 1], strides = [1, 1]} : vector<1x27xf32> to vector<1x1xf32>
    %cst_18 = arith.constant 0.000000e+00 : f32
    %85 = vector.broadcast %cst_18 : f32 to vector<8x9xf32>
    %86 = vector.extract_strided_slice %1 {offsets = [0, 0], sizes = [8, 55], strides = [1, 1]} : vector<8x64xf32> to vector<8x55xf32>
    %87 = tpu.concatenate %85, %86 in 1 : vector<8x9xf32>, vector<8x55xf32> -> vector<8x64xf32>
    %88 = vector.broadcast %84 : vector<1x1xf32> to vector<1x64xf32>
    %89 = arith.mulf %10, %88 : vector<1x64xf32>
    %90 = vector.broadcast %89 : vector<1x64xf32> to vector<8x64xf32>
    %91 = arith.mulf %87, %90 : vector<8x64xf32>
    %92 = arith.addf %83, %91 : vector<8x64xf32>
    %93 = vector.extract_strided_slice %3 {offsets = [0, 10], sizes = [1, 1], strides = [1, 1]} : vector<1x27xf32> to vector<1x1xf32>
    %cst_19 = arith.constant 0.000000e+00 : f32
    %94 = vector.broadcast %cst_19 : f32 to vector<8x8xf32>
    %95 = vector.extract_strided_slice %1 {offsets = [0, 0], sizes = [8, 56], strides = [1, 1]} : vector<8x64xf32> to vector<8x56xf32>
    %96 = tpu.concatenate %94, %95 in 1 : vector<8x8xf32>, vector<8x56xf32> -> vector<8x64xf32>
    %97 = vector.broadcast %93 : vector<1x1xf32> to vector<8x64xf32>
    %98 = arith.mulf %96, %97 : vector<8x64xf32>
    %99 = arith.addf %92, %98 : vector<8x64xf32>
    %100 = vector.extract_strided_slice %3 {offsets = [0, 11], sizes = [1, 1], strides = [1, 1]} : vector<1x27xf32> to vector<1x1xf32>
    %cst_20 = arith.constant 0.000000e+00 : f32
    %101 = vector.broadcast %cst_20 : f32 to vector<8x7xf32>
    %102 = vector.extract_strided_slice %1 {offsets = [0, 0], sizes = [8, 57], strides = [1, 1]} : vector<8x64xf32> to vector<8x57xf32>
    %103 = tpu.concatenate %101, %102 in 1 : vector<8x7xf32>, vector<8x57xf32> -> vector<8x64xf32>
    %104 = vector.broadcast %100 : vector<1x1xf32> to vector<1x64xf32>
    %105 = arith.mulf %9, %104 : vector<1x64xf32>
    %106 = vector.broadcast %105 : vector<1x64xf32> to vector<8x64xf32>
    %107 = arith.mulf %103, %106 : vector<8x64xf32>
    %108 = arith.addf %99, %107 : vector<8x64xf32>
    %109 = vector.extract_strided_slice %3 {offsets = [0, 12], sizes = [1, 1], strides = [1, 1]} : vector<1x27xf32> to vector<1x1xf32>
    %cst_21 = arith.constant 0.000000e+00 : f32
    %110 = vector.broadcast %cst_21 : f32 to vector<8x1xf32>
    %111 = vector.extract_strided_slice %1 {offsets = [0, 0], sizes = [8, 63], strides = [1, 1]} : vector<8x64xf32> to vector<8x63xf32>
    %112 = tpu.concatenate %110, %111 in 1 : vector<8x1xf32>, vector<8x63xf32> -> vector<8x64xf32>
    %113 = vector.broadcast %109 : vector<1x1xf32> to vector<1x64xf32>
    %114 = arith.mulf %10, %113 : vector<1x64xf32>
    %115 = vector.broadcast %114 : vector<1x64xf32> to vector<8x64xf32>
    %116 = arith.mulf %112, %115 : vector<8x64xf32>
    %117 = arith.addf %108, %116 : vector<8x64xf32>
    %118 = vector.extract_strided_slice %3 {offsets = [0, 13], sizes = [1, 1], strides = [1, 1]} : vector<1x27xf32> to vector<1x1xf32>
    %119 = vector.broadcast %118 : vector<1x1xf32> to vector<8x64xf32>
    %120 = arith.mulf %1, %119 : vector<8x64xf32>
    %121 = arith.addf %117, %120 : vector<8x64xf32>
    %122 = vector.extract_strided_slice %3 {offsets = [0, 14], sizes = [1, 1], strides = [1, 1]} : vector<1x27xf32> to vector<1x1xf32>
    %cst_22 = arith.constant 0.000000e+00 : f32
    %123 = vector.broadcast %cst_22 : f32 to vector<8x1xf32>
    %124 = vector.extract_strided_slice %1 {offsets = [0, 1], sizes = [8, 63], strides = [1, 1]} : vector<8x64xf32> to vector<8x63xf32>
    %125 = tpu.concatenate %124, %123 in 1 : vector<8x63xf32>, vector<8x1xf32> -> vector<8x64xf32>
    %126 = vector.broadcast %122 : vector<1x1xf32> to vector<1x64xf32>
    %127 = arith.mulf %9, %126 : vector<1x64xf32>
    %128 = vector.broadcast %127 : vector<1x64xf32> to vector<8x64xf32>
    %129 = arith.mulf %125, %128 : vector<8x64xf32>
    %130 = arith.addf %121, %129 : vector<8x64xf32>
    %131 = vector.extract_strided_slice %3 {offsets = [0, 15], sizes = [1, 1], strides = [1, 1]} : vector<1x27xf32> to vector<1x1xf32>
    %cst_23 = arith.constant 0.000000e+00 : f32
    %132 = vector.broadcast %cst_23 : f32 to vector<8x7xf32>
    %133 = vector.extract_strided_slice %1 {offsets = [0, 7], sizes = [8, 57], strides = [1, 1]} : vector<8x64xf32> to vector<8x57xf32>
    %134 = tpu.concatenate %133, %132 in 1 : vector<8x57xf32>, vector<8x7xf32> -> vector<8x64xf32>
    %135 = vector.broadcast %131 : vector<1x1xf32> to vector<1x64xf32>
    %136 = arith.mulf %10, %135 : vector<1x64xf32>
    %137 = vector.broadcast %136 : vector<1x64xf32> to vector<8x64xf32>
    %138 = arith.mulf %134, %137 : vector<8x64xf32>
    %139 = arith.addf %130, %138 : vector<8x64xf32>
    %140 = vector.extract_strided_slice %3 {offsets = [0, 16], sizes = [1, 1], strides = [1, 1]} : vector<1x27xf32> to vector<1x1xf32>
    %cst_24 = arith.constant 0.000000e+00 : f32
    %141 = vector.broadcast %cst_24 : f32 to vector<8x8xf32>
    %142 = vector.extract_strided_slice %1 {offsets = [0, 8], sizes = [8, 56], strides = [1, 1]} : vector<8x64xf32> to vector<8x56xf32>
    %143 = tpu.concatenate %142, %141 in 1 : vector<8x56xf32>, vector<8x8xf32> -> vector<8x64xf32>
    %144 = vector.broadcast %140 : vector<1x1xf32> to vector<8x64xf32>
    %145 = arith.mulf %143, %144 : vector<8x64xf32>
    %146 = arith.addf %139, %145 : vector<8x64xf32>
    %147 = vector.extract_strided_slice %3 {offsets = [0, 17], sizes = [1, 1], strides = [1, 1]} : vector<1x27xf32> to vector<1x1xf32>
    %cst_25 = arith.constant 0.000000e+00 : f32
    %148 = vector.broadcast %cst_25 : f32 to vector<8x9xf32>
    %149 = vector.extract_strided_slice %1 {offsets = [0, 9], sizes = [8, 55], strides = [1, 1]} : vector<8x64xf32> to vector<8x55xf32>
    %150 = tpu.concatenate %149, %148 in 1 : vector<8x55xf32>, vector<8x9xf32> -> vector<8x64xf32>
    %151 = vector.broadcast %147 : vector<1x1xf32> to vector<1x64xf32>
    %152 = arith.mulf %9, %151 : vector<1x64xf32>
    %153 = vector.broadcast %152 : vector<1x64xf32> to vector<8x64xf32>
    %154 = arith.mulf %150, %153 : vector<8x64xf32>
    %155 = arith.addf %146, %154 : vector<8x64xf32>
    %156 = vector.extract_strided_slice %3 {offsets = [0, 18], sizes = [1, 1], strides = [1, 1]} : vector<1x27xf32> to vector<1x1xf32>
    %cst_26 = arith.constant 0.000000e+00 : f32
    %157 = vector.broadcast %cst_26 : f32 to vector<8x9xf32>
    %158 = vector.extract_strided_slice %8 {offsets = [0, 0], sizes = [8, 55], strides = [1, 1]} : vector<8x64xf32> to vector<8x55xf32>
    %159 = tpu.concatenate %157, %158 in 1 : vector<8x9xf32>, vector<8x55xf32> -> vector<8x64xf32>
    %160 = vector.broadcast %156 : vector<1x1xf32> to vector<1x64xf32>
    %161 = arith.mulf %10, %160 : vector<1x64xf32>
    %162 = vector.broadcast %161 : vector<1x64xf32> to vector<8x64xf32>
    %163 = arith.mulf %159, %162 : vector<8x64xf32>
    %164 = arith.addf %155, %163 : vector<8x64xf32>
    %165 = vector.extract_strided_slice %3 {offsets = [0, 19], sizes = [1, 1], strides = [1, 1]} : vector<1x27xf32> to vector<1x1xf32>
    %cst_27 = arith.constant 0.000000e+00 : f32
    %166 = vector.broadcast %cst_27 : f32 to vector<8x8xf32>
    %167 = vector.extract_strided_slice %8 {offsets = [0, 0], sizes = [8, 56], strides = [1, 1]} : vector<8x64xf32> to vector<8x56xf32>
    %168 = tpu.concatenate %166, %167 in 1 : vector<8x8xf32>, vector<8x56xf32> -> vector<8x64xf32>
    %169 = vector.broadcast %165 : vector<1x1xf32> to vector<8x64xf32>
    %170 = arith.mulf %168, %169 : vector<8x64xf32>
    %171 = arith.addf %164, %170 : vector<8x64xf32>
    %172 = vector.extract_strided_slice %3 {offsets = [0, 20], sizes = [1, 1], strides = [1, 1]} : vector<1x27xf32> to vector<1x1xf32>
    %cst_28 = arith.constant 0.000000e+00 : f32
    %173 = vector.broadcast %cst_28 : f32 to vector<8x7xf32>
    %174 = vector.extract_strided_slice %8 {offsets = [0, 0], sizes = [8, 57], strides = [1, 1]} : vector<8x64xf32> to vector<8x57xf32>
    %175 = tpu.concatenate %173, %174 in 1 : vector<8x7xf32>, vector<8x57xf32> -> vector<8x64xf32>
    %176 = vector.broadcast %172 : vector<1x1xf32> to vector<1x64xf32>
    %177 = arith.mulf %9, %176 : vector<1x64xf32>
    %178 = vector.broadcast %177 : vector<1x64xf32> to vector<8x64xf32>
    %179 = arith.mulf %175, %178 : vector<8x64xf32>
    %180 = arith.addf %171, %179 : vector<8x64xf32>
    %181 = vector.extract_strided_slice %3 {offsets = [0, 21], sizes = [1, 1], strides = [1, 1]} : vector<1x27xf32> to vector<1x1xf32>
    %cst_29 = arith.constant 0.000000e+00 : f32
    %182 = vector.broadcast %cst_29 : f32 to vector<8x1xf32>
    %183 = vector.extract_strided_slice %8 {offsets = [0, 0], sizes = [8, 63], strides = [1, 1]} : vector<8x64xf32> to vector<8x63xf32>
    %184 = tpu.concatenate %182, %183 in 1 : vector<8x1xf32>, vector<8x63xf32> -> vector<8x64xf32>
    %185 = vector.broadcast %181 : vector<1x1xf32> to vector<1x64xf32>
    %186 = arith.mulf %10, %185 : vector<1x64xf32>
    %187 = vector.broadcast %186 : vector<1x64xf32> to vector<8x64xf32>
    %188 = arith.mulf %184, %187 : vector<8x64xf32>
    %189 = arith.addf %180, %188 : vector<8x64xf32>
    %190 = vector.extract_strided_slice %3 {offsets = [0, 22], sizes = [1, 1], strides = [1, 1]} : vector<1x27xf32> to vector<1x1xf32>
    %191 = vector.broadcast %190 : vector<1x1xf32> to vector<8x64xf32>
    %192 = arith.mulf %8, %191 : vector<8x64xf32>
    %193 = arith.addf %189, %192 : vector<8x64xf32>
    %194 = vector.extract_strided_slice %3 {offsets = [0, 23], sizes = [1, 1], strides = [1, 1]} : vector<1x27xf32> to vector<1x1xf32>
    %cst_30 = arith.constant 0.000000e+00 : f32
    %195 = vector.broadcast %cst_30 : f32 to vector<8x1xf32>
    %196 = vector.extract_strided_slice %8 {offsets = [0, 1], sizes = [8, 63], strides = [1, 1]} : vector<8x64xf32> to vector<8x63xf32>
    %197 = tpu.concatenate %196, %195 in 1 : vector<8x63xf32>, vector<8x1xf32> -> vector<8x64xf32>
    %198 = vector.broadcast %194 : vector<1x1xf32> to vector<1x64xf32>
    %199 = arith.mulf %9, %198 : vector<1x64xf32>
    %200 = vector.broadcast %199 : vector<1x64xf32> to vector<8x64xf32>
    %201 = arith.mulf %197, %200 : vector<8x64xf32>
    %202 = arith.addf %193, %201 : vector<8x64xf32>
    %203 = vector.extract_strided_slice %3 {offsets = [0, 24], sizes = [1, 1], strides = [1, 1]} : vector<1x27xf32> to vector<1x1xf32>
    %cst_31 = arith.constant 0.000000e+00 : f32
    %204 = vector.broadcast %cst_31 : f32 to vector<8x7xf32>
    %205 = vector.extract_strided_slice %8 {offsets = [0, 7], sizes = [8, 57], strides = [1, 1]} : vector<8x64xf32> to vector<8x57xf32>
    %206 = tpu.concatenate %205, %204 in 1 : vector<8x57xf32>, vector<8x7xf32> -> vector<8x64xf32>
    %207 = vector.broadcast %203 : vector<1x1xf32> to vector<1x64xf32>
    %208 = arith.mulf %10, %207 : vector<1x64xf32>
    %209 = vector.broadcast %208 : vector<1x64xf32> to vector<8x64xf32>
    %210 = arith.mulf %206, %209 : vector<8x64xf32>
    %211 = arith.addf %202, %210 : vector<8x64xf32>
    %212 = vector.extract_strided_slice %3 {offsets = [0, 25], sizes = [1, 1], strides = [1, 1]} : vector<1x27xf32> to vector<1x1xf32>
    %cst_32 = arith.constant 0.000000e+00 : f32
    %213 = vector.broadcast %cst_32 : f32 to vector<8x8xf32>
    %214 = vector.extract_strided_slice %8 {offsets = [0, 8], sizes = [8, 56], strides = [1, 1]} : vector<8x64xf32> to vector<8x56xf32>
    %215 = tpu.concatenate %214, %213 in 1 : vector<8x56xf32>, vector<8x8xf32> -> vector<8x64xf32>
    %216 = vector.broadcast %212 : vector<1x1xf32> to vector<8x64xf32>
    %217 = arith.mulf %215, %216 : vector<8x64xf32>
    %218 = arith.addf %211, %217 : vector<8x64xf32>
    %219 = vector.extract_strided_slice %3 {offsets = [0, 26], sizes = [1, 1], strides = [1, 1]} : vector<1x27xf32> to vector<1x1xf32>
    %cst_33 = arith.constant 0.000000e+00 : f32
    %220 = vector.broadcast %cst_33 : f32 to vector<8x9xf32>
    %221 = vector.extract_strided_slice %8 {offsets = [0, 9], sizes = [8, 55], strides = [1, 1]} : vector<8x64xf32> to vector<8x55xf32>
    %222 = tpu.concatenate %221, %220 in 1 : vector<8x55xf32>, vector<8x9xf32> -> vector<8x64xf32>
    %223 = vector.broadcast %219 : vector<1x1xf32> to vector<1x64xf32>
    %224 = arith.mulf %9, %223 : vector<1x64xf32>
    %225 = vector.broadcast %224 : vector<1x64xf32> to vector<8x64xf32>
    %226 = arith.mulf %222, %225 : vector<8x64xf32>
    %227 = arith.addf %218, %226 : vector<8x64xf32>
    %228 = arith.truncf %227 : vector<8x64xf32> to vector<8x64xbf16>
    %c0_34 = arith.constant 0 : index
    %c0_35 = arith.constant 0 : index
    %c0_36 = arith.constant 0 : index
    %c0_37 = arith.constant 0 : index
    %229 = vector.load %arg5[%c0_34, %c0_35, %c0_36, %c0_37] : memref<1x1x8x64xbf16, #tpu.memory_space<vmem>>, vector<1x1x8x64xbf16>
    %230 = vector.shape_cast %229 : vector<1x1x8x64xbf16> to vector<8x64xbf16>
    %231 = vector.shape_cast %228 : vector<8x64xbf16> to vector<1x1x8x64xbf16>
    tpu.vector_store %arg5[%c0_34, %c0_35, %c0_36, %c0_37], %231 {strides = array<i32>} : memref<1x1x8x64xbf16, #tpu.memory_space<vmem>>, vector<1x1x8x64xbf16>,
    %232 = arith.extf %228 : vector<8x64xbf16> to vector<8x64xf32>
    %233 = vector.shape_cast %232 : vector<8x64xf32> to vector<1x8x64xf32>
    %cst_38 = arith.constant dense<0.000000e+00> : vector<1xf32>
    %234 = vector.multi_reduction <add>, %233, %cst_38 [1, 2] : vector<1x8x64xf32> to vector<1xf32>
    %235 = vector.shape_cast %234 : vector<1xf32> to vector<1x1x1xf32>
    %236 = vector.extract %235[0, 0, 0] : f32 from vector<1x1x1xf32>
    %237 = vector.broadcast %236 : f32 to vector<1x1xf32>
    %c0_39 = arith.constant 0 : index
    %c0_40 = arith.constant 0 : index
    %c0_41 = arith.constant 0 : index
    %c0_42 = arith.constant 0 : index
    %238 = vector.load %arg6[%c0_39, %c0_40, %c0_41, %c0_42] : memref<1x1x1x1xf32, #tpu.memory_space<vmem>>, vector<1x1x1x1xf32>
    %239 = vector.shape_cast %238 : vector<1x1x1x1xf32> to vector<1x1xf32>
    %240 = vector.shape_cast %237 : vector<1x1xf32> to vector<1x1x1x1xf32>
    tpu.vector_store %arg6[%c0_39, %c0_40, %c0_41, %c0_42], %240 {strides = array<i32>} : memref<1x1x1x1xf32, #tpu.memory_space<vmem>>, vector<1x1x1x1xf32>,
    %241 = arith.mulf %232, %232 : vector<8x64xf32>
    %242 = vector.shape_cast %241 : vector<8x64xf32> to vector<1x8x64xf32>
    %cst_43 = arith.constant dense<0.000000e+00> : vector<1xf32>
    %243 = vector.multi_reduction <add>, %242, %cst_43 [1, 2] : vector<1x8x64xf32> to vector<1xf32>
    %244 = vector.shape_cast %243 : vector<1xf32> to vector<1x1x1xf32>
    %245 = vector.extract %244[0, 0, 0] : f32 from vector<1x1x1xf32>
    %246 = vector.broadcast %245 : f32 to vector<1x1xf32>
    %c0_44 = arith.constant 0 : index
    %c0_45 = arith.constant 0 : index
    %c0_46 = arith.constant 0 : index
    %c0_47 = arith.constant 0 : index
    %247 = vector.load %arg7[%c0_44, %c0_45, %c0_46, %c0_47] : memref<1x1x1x1xf32, #tpu.memory_space<vmem>>, vector<1x1x1x1xf32>
    %248 = vector.shape_cast %247 : vector<1x1x1x1xf32> to vector<1x1xf32>
    %249 = vector.shape_cast %246 : vector<1x1xf32> to vector<1x1x1x1xf32>
    tpu.vector_store %arg7[%c0_44, %c0_45, %c0_46, %c0_47], %249 {strides = array<i32>} : memref<1x1x1x1xf32, #tpu.memory_space<vmem>>, vector<1x1x1x1xf32>,
    return
  }
  func.func @transform_0(%arg0: i32, %arg1: i32) -> (i32, i32, i32, i32) {
    %c0_i32 = arith.constant 0 : i32
    %c0_i32_0 = arith.constant 0 : i32
    %c0_i32_1 = arith.constant 0 : i32
    return %arg0, %arg1, %c0_i32, %c0_i32_0 : i32, i32, i32, i32
  }
  func.func @transform_1(%arg0: i32, %arg1: i32) -> (i32, i32, i32) {
    %c0_i32 = arith.constant 0 : i32
    %c0_i32_0 = arith.constant 0 : i32
    %c0_i32_1 = arith.constant 0 : i32
    return %arg1, %c0_i32, %c0_i32_0 : i32, i32, i32
  }
  func.func @transform_2(%arg0: i32, %arg1: i32) -> (i32, i32) {
    %c0_i32 = arith.constant 0 : i32
    %c0_i32_0 = arith.constant 0 : i32
    %c0_i32_1 = arith.constant 0 : i32
    return %c0_i32, %c0_i32_0 : i32, i32
  }
  func.func @transform_3(%arg0: i32, %arg1: i32) -> (i32, i32, i32, i32) {
    %c0_i32 = arith.constant 0 : i32
    %c0_i32_0 = arith.constant 0 : i32
    %c0_i32_1 = arith.constant 0 : i32
    return %arg0, %arg1, %c0_i32, %c0_i32_0 : i32, i32, i32, i32
  }
  func.func @transform_4(%arg0: i32, %arg1: i32) -> (i32, i32, i32, i32) {
    %c0_i32 = arith.constant 0 : i32
    %c0_i32_0 = arith.constant 0 : i32
    %c0_i32_1 = arith.constant 0 : i32
    return %arg0, %arg1, %c0_i32, %c0_i32_0 : i32, i32, i32, i32
  }
  func.func @transform_5(%arg0: i32, %arg1: i32) -> (i32, i32, i32, i32) {
    %c0_i32 = arith.constant 0 : i32
    %c0_i32_0 = arith.constant 0 : i32
    %c0_i32_1 = arith.constant 0 : i32
    return %arg0, %arg1, %c0_i32, %c0_i32_0 : i32, i32, i32, i32
  }
}

module attributes {stable_mosaic.version = 11 : i64} {
  func.func @pw_stats_kernel(%arg0: i32, %arg1: i32, %arg2: memref<1x8x512xbf16, #tpu.memory_space<vmem>>, %arg3: memref<8x1xf32, #tpu.memory_space<vmem>>, %arg4: memref<8x1xf32, #tpu.memory_space<vmem>>, %arg5: memref<1x1x8x1xf32, #tpu.memory_space<vmem>>, %arg6: memref<1x1x8x8xf32, #tpu.memory_space<vmem>>) attributes {dimension_semantics = [#tpu.dimension_semantics<parallel>, #tpu.dimension_semantics<parallel>], iteration_bounds = array<i64: 2, 1>, scalar_prefetch = 0 : i64, scratch_operands = 0 : i64, tpu.core_type = #tpu.core_type<tc>, window_params = [{transform_indices = @transform_0, window_bounds = array<i64: 1, 8, 512>}, {pipeline_mode = #tpu.pipeline_mode<synchronous>, transform_indices = @transform_1, window_bounds = array<i64: 8, 1>}, {pipeline_mode = #tpu.pipeline_mode<synchronous>, transform_indices = @transform_2, window_bounds = array<i64: 8, 1>}, {transform_indices = @transform_3, window_bounds = array<i64: 1, 1, 8, 1>}, {transform_indices = @transform_4, window_bounds = array<i64: 1, 1, 8, 8>}]} {
    %c0 = arith.constant 0 : index
    %c0_0 = arith.constant 0 : index
    %c0_1 = arith.constant 0 : index
    %0 = vector.load %arg2[%c0, %c0_0, %c0_1] : memref<1x8x512xbf16, #tpu.memory_space<vmem>>, vector<1x8x512xbf16>
    %1 = vector.shape_cast %0 : vector<1x8x512xbf16> to vector<8x512xbf16>
    %2 = arith.extf %1 : vector<8x512xbf16> to vector<8x512xf32>
    %c0_2 = arith.constant 0 : index
    %c0_3 = arith.constant 0 : index
    %3 = vector.load %arg3[%c0_2, %c0_3] : memref<8x1xf32, #tpu.memory_space<vmem>>, vector<8x1xf32>
    %4 = vector.broadcast %3 : vector<8x1xf32> to vector<8x512xf32>
    %5 = arith.mulf %2, %4 : vector<8x512xf32>
    %c0_4 = arith.constant 0 : index
    %c0_5 = arith.constant 0 : index
    %6 = vector.load %arg4[%c0_4, %c0_5] : memref<8x1xf32, #tpu.memory_space<vmem>>, vector<8x1xf32>
    %7 = vector.broadcast %6 : vector<8x1xf32> to vector<8x512xf32>
    %8 = arith.addf %5, %7 : vector<8x512xf32>
    %cst = arith.constant 0.000000e+00 : f32
    %9 = vector.broadcast %cst : f32 to vector<8x512xf32>
    %10 = arith.maximumf %8, %9 : vector<8x512xf32>
    %11 = arith.truncf %10 : vector<8x512xf32> to vector<8x512xbf16>
    %12 = arith.extf %11 : vector<8x512xbf16> to vector<8x512xf32>
    %cst_6 = arith.constant dense<0.000000e+00> : vector<8xf32>
    %13 = vector.multi_reduction <add>, %12, %cst_6 [1] : vector<8x512xf32> to vector<8xf32>
    %14 = vector.shape_cast %13 : vector<8xf32> to vector<8x1xf32>
    %c0_7 = arith.constant 0 : index
    %c0_8 = arith.constant 0 : index
    %c0_9 = arith.constant 0 : index
    %c0_10 = arith.constant 0 : index
    %15 = vector.load %arg5[%c0_7, %c0_8, %c0_9, %c0_10] : memref<1x1x8x1xf32, #tpu.memory_space<vmem>>, vector<1x1x8x1xf32>
    %16 = vector.shape_cast %15 : vector<1x1x8x1xf32> to vector<8x1xf32>
    %17 = vector.shape_cast %14 : vector<8x1xf32> to vector<1x1x8x1xf32>
    tpu.vector_store %arg5[%c0_7, %c0_8, %c0_9, %c0_10], %17 {strides = array<i32>} : memref<1x1x8x1xf32, #tpu.memory_space<vmem>>, vector<1x1x8x1xf32>,
    %cst_11 = arith.constant dense<0.000000e+00> : vector<8x8xf32>
    %18 = tpu.matmul %11, %11, %cst_11 {dimension_numbers = #tpu.dot_dimension_numbers<[1], [1], [0], [0], [0, 0, 1, 0], [], []>} : vector<8x512xbf16>, vector<8x512xbf16>, vector<8x8xf32> -> vector<8x8xf32>
    %c0_12 = arith.constant 0 : index
    %c0_13 = arith.constant 0 : index
    %c0_14 = arith.constant 0 : index
    %c0_15 = arith.constant 0 : index
    %19 = vector.load %arg6[%c0_12, %c0_13, %c0_14, %c0_15] : memref<1x1x8x8xf32, #tpu.memory_space<vmem>>, vector<1x1x8x8xf32>
    %20 = vector.shape_cast %19 : vector<1x1x8x8xf32> to vector<8x8xf32>
    %21 = vector.shape_cast %18 : vector<8x8xf32> to vector<1x1x8x8xf32>
    tpu.vector_store %arg6[%c0_12, %c0_13, %c0_14, %c0_15], %21 {strides = array<i32>} : memref<1x1x8x8xf32, #tpu.memory_space<vmem>>, vector<1x1x8x8xf32>,
    return
  }
  func.func @transform_0(%arg0: i32, %arg1: i32) -> (i32, i32, i32) {
    %c0_i32 = arith.constant 0 : i32
    %c0_i32_0 = arith.constant 0 : i32
    return %arg0, %c0_i32, %arg1 : i32, i32, i32
  }
  func.func @transform_1(%arg0: i32, %arg1: i32) -> (i32, i32) {
    %c0_i32 = arith.constant 0 : i32
    %c0_i32_0 = arith.constant 0 : i32
    %c0_i32_1 = arith.constant 0 : i32
    return %c0_i32, %c0_i32_0 : i32, i32
  }
  func.func @transform_2(%arg0: i32, %arg1: i32) -> (i32, i32) {
    %c0_i32 = arith.constant 0 : i32
    %c0_i32_0 = arith.constant 0 : i32
    %c0_i32_1 = arith.constant 0 : i32
    return %c0_i32, %c0_i32_0 : i32, i32
  }
  func.func @transform_3(%arg0: i32, %arg1: i32) -> (i32, i32, i32, i32) {
    %c0_i32 = arith.constant 0 : i32
    %c0_i32_0 = arith.constant 0 : i32
    %c0_i32_1 = arith.constant 0 : i32
    return %arg0, %arg1, %c0_i32, %c0_i32_0 : i32, i32, i32, i32
  }
  func.func @transform_4(%arg0: i32, %arg1: i32) -> (i32, i32, i32, i32) {
    %c0_i32 = arith.constant 0 : i32
    %c0_i32_0 = arith.constant 0 : i32
    %c0_i32_1 = arith.constant 0 : i32
    return %arg0, %arg1, %c0_i32, %c0_i32_0 : i32, i32, i32, i32
  }
}

module attributes {stable_mosaic.version = 11 : i64} {
  func.func @pw_out_kernel(%arg0: i32, %arg1: i32, %arg2: memref<1x8x512xbf16, #tpu.memory_space<vmem>>, %arg3: memref<8x1xf32, #tpu.memory_space<vmem>>, %arg4: memref<8x1xf32, #tpu.memory_space<vmem>>, %arg5: memref<16x8xbf16, #tpu.memory_space<vmem>>, %arg6: memref<16x1xf32, #tpu.memory_space<vmem>>, %arg7: memref<16x1xf32, #tpu.memory_space<vmem>>, %arg8: memref<1x16x512xf32, #tpu.memory_space<vmem>>) attributes {dimension_semantics = [#tpu.dimension_semantics<parallel>, #tpu.dimension_semantics<parallel>], iteration_bounds = array<i64: 2, 1>, scalar_prefetch = 0 : i64, scratch_operands = 0 : i64, tpu.core_type = #tpu.core_type<tc>, window_params = [{transform_indices = @transform_0, window_bounds = array<i64: 1, 8, 512>}, {pipeline_mode = #tpu.pipeline_mode<synchronous>, transform_indices = @transform_1, window_bounds = array<i64: 8, 1>}, {pipeline_mode = #tpu.pipeline_mode<synchronous>, transform_indices = @transform_2, window_bounds = array<i64: 8, 1>}, {pipeline_mode = #tpu.pipeline_mode<synchronous>, transform_indices = @transform_3, window_bounds = array<i64: 16, 8>}, {pipeline_mode = #tpu.pipeline_mode<synchronous>, transform_indices = @transform_4, window_bounds = array<i64: 16, 1>}, {pipeline_mode = #tpu.pipeline_mode<synchronous>, transform_indices = @transform_5, window_bounds = array<i64: 16, 1>}, {transform_indices = @transform_6, window_bounds = array<i64: 1, 16, 512>}]} {
    %c0 = arith.constant 0 : index
    %c0_0 = arith.constant 0 : index
    %c0_1 = arith.constant 0 : index
    %0 = vector.load %arg2[%c0, %c0_0, %c0_1] : memref<1x8x512xbf16, #tpu.memory_space<vmem>>, vector<1x8x512xbf16>
    %1 = vector.shape_cast %0 : vector<1x8x512xbf16> to vector<8x512xbf16>
    %2 = arith.extf %1 : vector<8x512xbf16> to vector<8x512xf32>
    %c0_2 = arith.constant 0 : index
    %c0_3 = arith.constant 0 : index
    %3 = vector.load %arg3[%c0_2, %c0_3] : memref<8x1xf32, #tpu.memory_space<vmem>>, vector<8x1xf32>
    %4 = vector.broadcast %3 : vector<8x1xf32> to vector<8x512xf32>
    %5 = arith.mulf %2, %4 : vector<8x512xf32>
    %c0_4 = arith.constant 0 : index
    %c0_5 = arith.constant 0 : index
    %6 = vector.load %arg4[%c0_4, %c0_5] : memref<8x1xf32, #tpu.memory_space<vmem>>, vector<8x1xf32>
    %7 = vector.broadcast %6 : vector<8x1xf32> to vector<8x512xf32>
    %8 = arith.addf %5, %7 : vector<8x512xf32>
    %cst = arith.constant 0.000000e+00 : f32
    %9 = vector.broadcast %cst : f32 to vector<8x512xf32>
    %10 = arith.maximumf %8, %9 : vector<8x512xf32>
    %c0_6 = arith.constant 0 : index
    %c0_7 = arith.constant 0 : index
    %11 = vector.load %arg5[%c0_6, %c0_7] : memref<16x8xbf16, #tpu.memory_space<vmem>>, vector<16x8xbf16>
    %12 = arith.truncf %10 : vector<8x512xf32> to vector<8x512xbf16>
    %cst_8 = arith.constant dense<0.000000e+00> : vector<16x512xf32>
    %13 = tpu.matmul %11, %12, %cst_8 {dimension_numbers = #tpu.dot_dimension_numbers<[1], [0], [0], [1], [0, 0, 1, 1], [], []>} : vector<16x8xbf16>, vector<8x512xbf16>, vector<16x512xf32> -> vector<16x512xf32>
    %c0_9 = arith.constant 0 : index
    %c0_10 = arith.constant 0 : index
    %14 = vector.load %arg6[%c0_9, %c0_10] : memref<16x1xf32, #tpu.memory_space<vmem>>, vector<16x1xf32>
    %15 = vector.broadcast %14 : vector<16x1xf32> to vector<16x512xf32>
    %16 = arith.mulf %13, %15 : vector<16x512xf32>
    %c0_11 = arith.constant 0 : index
    %c0_12 = arith.constant 0 : index
    %17 = vector.load %arg7[%c0_11, %c0_12] : memref<16x1xf32, #tpu.memory_space<vmem>>, vector<16x1xf32>
    %18 = vector.broadcast %17 : vector<16x1xf32> to vector<16x512xf32>
    %19 = arith.addf %16, %18 : vector<16x512xf32>
    %cst_13 = arith.constant 0.000000e+00 : f32
    %20 = vector.broadcast %cst_13 : f32 to vector<16x512xf32>
    %21 = arith.maximumf %19, %20 : vector<16x512xf32>
    %c0_14 = arith.constant 0 : index
    %c0_15 = arith.constant 0 : index
    %c0_16 = arith.constant 0 : index
    %22 = vector.load %arg8[%c0_14, %c0_15, %c0_16] : memref<1x16x512xf32, #tpu.memory_space<vmem>>, vector<1x16x512xf32>
    %23 = vector.shape_cast %22 : vector<1x16x512xf32> to vector<16x512xf32>
    %24 = vector.shape_cast %21 : vector<16x512xf32> to vector<1x16x512xf32>
    tpu.vector_store %arg8[%c0_14, %c0_15, %c0_16], %24 {strides = array<i32>} : memref<1x16x512xf32, #tpu.memory_space<vmem>>, vector<1x16x512xf32>,
    return
  }
  func.func @transform_0(%arg0: i32, %arg1: i32) -> (i32, i32, i32) {
    %c0_i32 = arith.constant 0 : i32
    %c0_i32_0 = arith.constant 0 : i32
    return %arg0, %c0_i32, %arg1 : i32, i32, i32
  }
  func.func @transform_1(%arg0: i32, %arg1: i32) -> (i32, i32) {
    %c0_i32 = arith.constant 0 : i32
    %c0_i32_0 = arith.constant 0 : i32
    %c0_i32_1 = arith.constant 0 : i32
    return %c0_i32, %c0_i32_0 : i32, i32
  }
  func.func @transform_2(%arg0: i32, %arg1: i32) -> (i32, i32) {
    %c0_i32 = arith.constant 0 : i32
    %c0_i32_0 = arith.constant 0 : i32
    %c0_i32_1 = arith.constant 0 : i32
    return %c0_i32, %c0_i32_0 : i32, i32
  }
  func.func @transform_3(%arg0: i32, %arg1: i32) -> (i32, i32) {
    %c0_i32 = arith.constant 0 : i32
    %c0_i32_0 = arith.constant 0 : i32
    %c0_i32_1 = arith.constant 0 : i32
    return %c0_i32, %c0_i32_0 : i32, i32
  }
  func.func @transform_4(%arg0: i32, %arg1: i32) -> (i32, i32) {
    %c0_i32 = arith.constant 0 : i32
    %c0_i32_0 = arith.constant 0 : i32
    %c0_i32_1 = arith.constant 0 : i32
    return %c0_i32, %c0_i32_0 : i32, i32
  }
  func.func @transform_5(%arg0: i32, %arg1: i32) -> (i32, i32) {
    %c0_i32 = arith.constant 0 : i32
    %c0_i32_0 = arith.constant 0 : i32
    %c0_i32_1 = arith.constant 0 : i32
    return %c0_i32, %c0_i32_0 : i32, i32
  }
  func.func @transform_6(%arg0: i32, %arg1: i32) -> (i32, i32, i32) {
    %c0_i32 = arith.constant 0 : i32
    %c0_i32_0 = arith.constant 0 : i32
    return %arg0, %c0_i32, %arg1 : i32, i32, i32
  }
}

</mosaic_0001>

<bundles_post_ra>
// kernel: mobilenet3d_block.3
= control target key start
LH: loop header
LB: loop body
LE: loop exit
PB: predicated region body
PF: predicated region fallthrough
CT: control target
= control target key end

     0   :  { %s1188_s18 = smov 0   ;;  %s1190_s19 = smov 0   ;;  %s1445_s0 = inlined_call_operand.vmem [shape: f32[2,8,8,64], index: 0, kind: input, shape index: {}]   ;;  %s1446_s1 = inlined_call_operand.vmem [shape: f32[8,1,27], index: 1, kind: input, shape index: {}]   ;;  %s1447_s2 = inlined_call_operand.vmem [shape: f32[2,64], index: 2, kind: input, shape index: {}]   ;;  %s1448_s3 = inlined_call_operand.vmem [shape: bf16[2,8,8,64], index: 3, kind: output, shape index: {0}]   ;;  %s1449_s4 = inlined_call_operand.vmem [shape: f32[2,8,1,1], index: 4, kind: output, shape index: {1}]   ;;  %s1450_s5 = inlined_call_operand.vmem [shape: f32[2,8,1,1], index: 5, kind: output, shape index: {2}]  }
   0x1   :  { %s1192_s20 = smov 0   ;;  %s1194_s21 = smov 0  }
   0x2   :  { %s1196_s22 = smov 0  }
   0x3 LB: > { %s25_s23 = sadd.s32 1, %s1113_s20  ;;  %s28_s24 = sadd.s32 1, %s1117_s21  ;;  %s1121_s22 = sphi %s1196_s22, %s16_s22   ;;  %s1117_s21 = sphi %s1194_s21, %s1454_s21   ;;  %s1113_s20 = sphi %s1192_s20, %s1453_s20   ;;  %s1109_s19 = sphi %s1190_s19, %s1452_s19   ;;  %s1105_s18 = sphi %s1188_s18, %s1451_s18  }
   0x4   : > { %p26_p0 = scmp.ge.s32.totalorder %s25_s23, 8  ;;  %p967_p1 = scmp.ge.s32.totalorder %s1121_s22, 1 }
   0x5   : > { %p223_p2 = scmp.lt.s32.totalorder %s1121_s22, 17 }
   0x6   : > { %s1456_s23 = smov (%p26_p0, %s25_s23), 0  ;;  %s1458_s24 = smov (!%p26_p0, %s28_s24), %s1117_s21 }
   0x7   : > { %p224_p3 = pnand %p967_p1, %p223_p2  ;;  %p30_p4 = scmp.ge.s32.totalorder %s1458_s24, 2 }
   0x8   : > { %p276_p5 = scmp.lt.s32.totalorder (!%p224_p3), %s1105_s18, 7  ;;  %p274_p6 = scmp.lt.s32.totalorder (!%p224_p3), %s1109_s19, 1  ;;  %v1123_v0 = vmov (!%p224_p3), 3   ;;  %v1124_v1 = vmov (!%p224_p3), 0   ;;  %v331_v2 = vlaneseq (!%p224_p3)  ;;  %v1125_v6 = vmov (!%p224_p3), 5  }
   0x9   : > { %s1460_s24 = smov (%p30_p4, %s1458_s24), 0  ;;  %227 = sbr.rel (%p224_p3) target bundleno = 490 (0x1ea), region = 32 }
   0xa   : > { %1057 = vset.pattern.permute.xlu1 (!%p224_p3), %v1123_v0  ;;  %1055 = vset.pattern.permute.xlu0 (!%p224_p3), %v1124_v1  ;;  %v332_v3 = vshrl.u32 (!%p224_p3), %v331_v2, 7  ;;  %v1126_v7 = vmov (!%p224_p3), 2   ;;  %vm312_vm0 = vcmask (!%p224_p3), 1040384   ;;  %v1127_v11 = vmov (!%p224_p3), 1   ;;  %s1130_s9 = smov (!%p224_p3), 9   ;;  %s1132_s10 = smov (!%p224_p3), 8  }
   0xb   : > { %v1128_v12 = vmov (!%p224_p3), 6   ;;  %v1129_v14 = vmov (!%p224_p3), 4   ;;  %v1131_v15 = vmov (!%p224_p3), 8   ;;  %s1133_s11 = smov (!%p224_p3), 1   ;;  %v1134_v16 = vmov (!%p224_p3), 7   ;;  %s1135_s12 = smov (!%p224_p3), 7  }
   0xc   : > { %v1228_v5 = vsub.s32 (!%p224_p3), 0, %v332_v3  ;;  %s1136_s13 = smov (!%p224_p3), 121   ;;  %v1137_v17 = vmov (!%p224_p3), 16   ;;  %v1138_v18 = vmov (!%p224_p3), 9   ;;  %s1139_s14 = smov (!%p224_p3), 120   ;;  %v1142_v19 = vmov (!%p224_p3), 11  }
   0xd   : > { %s1140_s15 = smov (!%p224_p3), 127   ;;  %s1141_s16 = smov (!%p224_p3), 119   ;;  %v1143_v20 = vmov (!%p224_p3), 12   ;;  %v1144_v21 = vmov (!%p224_p3), 10   ;;  %v1145_v22 = vmov (!%p224_p3), 14   ;;  %v1146_v23 = vmov (!%p224_p3), 15  }
   0xe   : > { %v1147_v24 = vmov (!%p224_p3), 26   ;;  %v1148_v25 = vmov (!%p224_p3), 13   ;;  %vm316_vm1 = vcmask (!%p224_p3), 1046528   ;;  %v1149_v27 = vmov (!%p224_p3), 17   ;;  %v1325_v56 = vld [vmem:[%s1447_s2 + $0x1] sm:$0x1] (!%p224_p3) }
   0xf   : > { %v1150_v29 = vmov (!%p224_p3), 18   ;;  %v1151_v30 = vmov (!%p224_p3), 20   ;;  %v1152_v31 = vmov (!%p224_p3), 21   ;;  %v1153_v32 = vmov (!%p224_p3), 19   ;;  %v1330_v57 = vld [vmem:[%s1447_s2] sm:$0x1] (!%p224_p3) }
  0x10   : > { %s1462_s18 = smov (!%p276_p5, %s1105_s18), 7  ;;  %s1464_s19 = smov (!%p274_p6, %s1109_s19), 1  ;;  %v1154_v33 = vmov 23   ;;  %v1155_v34 = vmov 24   ;;  %v1156_v35 = vmov 22   ;;  %v1157_v36 = vmov 25  }
  0x11   : > { %s284_s27 = scalar_lea.vmem %s1446_s1, %s1462_s18  ;;  %s968_s28 = sshll.u32 %s1464_s19, 3  ;;  %vm345_vm2 = vcmask 64512   ;;  %vm324_vm3 = vcmask 72704   ;;  %vm360_vm4 = vcmask 56320   ;;  %vm380_vm5 = vcmask 7168  }
  0x12   : > { %v1221_v4 = vld [vmem:[%s284_s27] sm:$0x1]  ;;  %s1225_s29 = sadd.s32 %s968_s28, %s1462_s18  ;;  %vm406_vm6 = vcmask 515072   ;;  %vm426_vm7 = vcmask 465920   ;;  %vm446_vm8 = vcmask 457728   ;;  %vm457_vm9 = vcmask 449536  }
  0x13   : > { %383 = vperm.xlu1 %1057, %v1221_v4   ;;  %328 = vperm.xlu0 %1055, %v1221_v4   ;;  %s969_s30 = sshll.u32 %s1225_s29, 3  ;;  %v1239_v9 = vrot.slane %v1221_v4, %v1228_v5  ;;  %s971_s26 = sshll.u32 %s1225_s29, 2  ;;  %vm756_vm10 = vcmask 519168   ;;  %vm759_vm11 = vcmask 523264   ;;  %vm771_vm12 = vcmask 0  }
  0x14   : > { %s281_s8 = scalar_lea.vmem %s1445_s0, %s969_s30  ;;  %s292_s30 = scalar_lea.vmem %s1448_s3, %s971_s26 }
  0x15   : > { %v1233_v8 = vld [vmem:[%s281_s8] sm:$0xff]  ;;  %s299_s8 = scalar_lea.vmem %s1449_s4, %s1225_s29 }
  0x16   : > { %v310_v10 = vrot.slane %v1233_v8, 7  ;;  %v314_v26 = vrot.slane %v1233_v8, 1 }
  0x17   : > { %1058 = vset.pattern.permute.xlu1 %v1125_v6  ;;  %1056 = vset.pattern.permute.xlu0 %v1126_v7 }
  0x18   : > { %409 = vperm.xlu1 %1058, %v1221_v4   ;;  %363 = vperm.xlu0 %1056, %v1221_v4   ;;  %v1244_v13 = vsel %vm312_vm0, 0.0, %v310_v10  ;;  %v1288_v28 = vsel %vm316_vm1, %v314_v26, 0.0 }
  0x1c   : > { %1060 = vset.pattern.permute.xlu1 %v1127_v11  ;;  %1059 = vset.pattern.permute.xlu0 %v1128_v12 }
  0x1d   : > { %429 = vperm.xlu0 %1059, %v1221_v4   ;;  %352 = vperm.xlu1 %1060, %v1239_v9  }
  0x21   : > { %1061 = vset.pattern.permute.xlu0 %v1129_v14  ;;  %321 = vrot.lane.b32.xlu1 %v1244_v13, %s1130_s9 }
  0x22   : > { %398 = vperm.xlu0 %1061, %v1239_v9   ;;  %1062 = vset.pattern.permute.xlu1 %v1131_v15 }
  0x25   : > { %342 = vrot.lane.b32.xlu1 %v1244_v13, %s1132_s10 }
  0x26   : > { %377 = vrot.lane.b32.xlu0 %v1244_v13, %s1133_s11 }
  0x27   : > { %1064 = vset.pattern.permute.xlu0 %v1134_v16 }
  0x29   : > { %357 = vrot.lane.b32.xlu1 %v1244_v13, %s1135_s12 }
  0x2a   : > { %449 = vperm.xlu0 %1064, %v1239_v9  }
  0x2d   : > { %460 = vperm.xlu1 %1062, %v1221_v4  }
  0x2e   : > { %423 = vrot.lane.b32.xlu0 %v1244_v13, %s1136_s13 }
  0x2f   : > { %1073 = vset.pattern.permute.xlu0 %v1137_v17 }
  0x31   : > { %1063 = vset.pattern.permute.xlu1 %v1138_v18 }
  0x32   : > { %479 = vperm.xlu1 %1063, %v1221_v4   ;;  %443 = vrot.lane.b32.xlu0 %v1244_v13, %s1139_s14 }
  0x36   : > { %403 = vrot.lane.b32.xlu1 %v1244_v13, %s1140_s15  ;;  %454 = vrot.lane.b32.xlu0 %v1244_v13, %s1141_s16 }
  0x37   : > { %1065 = vset.pattern.permute.xlu1 %v1142_v19 }
  0x3a   : > { %508 = vperm.xlu1 %1065, %v1221_v4   ;;  %474 = vrot.lane.b32.xlu0 %v1233_v8, %s1130_s9 }
  0x3e   : > { %1066 = vset.pattern.permute.xlu1 %v1143_v20  ;;  %493 = vrot.lane.b32.xlu0 %v1233_v8, %s1132_s10 }
  0x3f   : > { %527 = vperm.xlu1 %1066, %v1221_v4  }
  0x42   : > { %503 = vrot.lane.b32.xlu0 %v1233_v8, %s1135_s12 }
  0x43   : > { %1067 = vset.pattern.permute.xlu1 %v1144_v21 }
  0x44   : > { %498 = vperm.xlu1 %1067, %v1239_v9  }
  0x46   : > { %522 = vrot.lane.b32.xlu0 %v1233_v8, %s1133_s11 }
  0x48   : > { %1068 = vset.pattern.permute.xlu1 %v1145_v22 }
  0x49   : > { %552 = vperm.xlu1 %1068, %v1221_v4  }
  0x4a   : > { %590 = vperm.xlu0 %1073, %v1239_v9  }
  0x4d   : > { %1069 = vset.pattern.permute.xlu1 %v1146_v23 }
  0x4e   : > { %571 = vperm.xlu1 %1069, %v1221_v4   ;;  %566 = vrot.lane.b32.xlu0 %v1233_v8, %s1136_s13 }
  0x4f   : > { %1082 = vset.pattern.permute.xlu0 %v1147_v24 }
  0x52   : > { %1070 = vset.pattern.permute.xlu1 %v1148_v25  ;;  %585 = vrot.lane.b32.xlu0 %v1233_v8, %s1139_s14 }
  0x53   : > { %542 = vperm.xlu1 %1070, %v1239_v9  }
  0x56   : > { %595 = vrot.lane.b32.xlu0 %v1233_v8, %s1141_s16 }
  0x57   : > { %1071 = vset.pattern.permute.xlu1 %v1149_v27 }
  0x58   : > { %600 = vperm.xlu1 %1071, %v1221_v4  }
  0x5a   : > { %615 = vrot.lane.b32.xlu0 %v1288_v28, %s1130_s9 }
  0x5c   : > { %1072 = vset.pattern.permute.xlu1 %v1150_v29 }
  0x5d   : > { %620 = vperm.xlu1 %1072, %v1221_v4  }
  0x5e   : > { %634 = vrot.lane.b32.xlu0 %v1288_v28, %s1132_s10 }
  0x61   : > { %547 = vrot.lane.b32.xlu1 %v1233_v8, %s1140_s15 }
  0x62   : > { %1074 = vset.pattern.permute.xlu1 %v1151_v30  ;;  %644 = vrot.lane.b32.xlu0 %v1288_v28, %s1135_s12  ;;  %s306_s12 = scalar_lea.vmem %s1450_s5, %s1225_s29 }
  0x65   : > { %649 = vperm.xlu1 %1074, %v1221_v4  }
  0x66   : > { %663 = vrot.lane.b32.xlu0 %v1288_v28, %s1133_s11 }
  0x69   : > { %1075 = vset.pattern.permute.xlu1 %v1152_v31 }
  0x6a   : > { %668 = vperm.xlu1 %1075, %v1221_v4   ;;  %688 = vrot.lane.b32.xlu0 %v1288_v28, %s1140_s15 }
  0x6e   : > { %1076 = vset.pattern.permute.xlu1 %v1153_v32  ;;  %726 = vrot.lane.b32.xlu0 %v1288_v28, %s1139_s14 }
  0x6f   : > { %639 = vperm.xlu1 %1076, %v1239_v9  }
  0x73   : > { %1077 = vset.pattern.permute.xlu1 %v1154_v33 }
  0x74   : > { %693 = vperm.xlu1 %1077, %v1221_v4  }
  0x78   : > { %1078 = vset.pattern.permute.xlu1 %v1155_v34 }
  0x79   : > { %712 = vperm.xlu1 %1078, %v1221_v4  }
  0x7d   : > { %1079 = vset.pattern.permute.xlu1 %v1156_v35 }
  0x7e   : > { %683 = vperm.xlu1 %1079, %v1239_v9  }
  0x82   : > { %1080 = vset.pattern.permute.xlu1 %v1147_v24 }
  0x83   : > { %741 = vperm.xlu1 %1080, %v1221_v4  }
  0x87   : > { %1081 = vset.pattern.permute.xlu1 %v1157_v36 }
  0x88   : > { %731 = vperm.xlu1 %1081, %v1239_v9  }
  0x8c   : > { %707 = vrot.lane.b32.xlu1 %v1288_v28, %s1136_s13 }
  0x90   : > { %736 = vrot.lane.b32.xlu1 %v1288_v28, %s1141_s16 }
  0x92   : > { %v384_v37 = vpop.permute.xlu1 %383  ;;  %v329_v38 = vpop.permute.xlu0 %328 }
  0x93   : > { %v334_v52 = vrot.slane %v329_v38, %v1228_v5  ;;  %v389_v63 = vrot.slane %v384_v37, %v1228_v5 }
  0x95   : > { %v335_v58 = vmul.f32 %v334_v52, %v1325_v56  ;;  %v390_v7 = vmul.f32 %v389_v63, %v1325_v56 }
  0x97   : > { %v410_v39 = vpop.permute.xlu1 %409  ;;  %v364_v40 = vpop.permute.xlu0 %363  ;;  %v339_v0 = vrot.slane %v335_v58, %v1228_v5  ;;  %v394_v19 = vrot.slane %v390_v7, %v1228_v5 }
  0x98   : > { %v369_v53 = vrot.slane %v364_v40, %v1228_v5  ;;  %v415_v9 = vrot.slane %v410_v39, %v1228_v5 }
  0x9a   : > { %v370_v59 = vmul.f32 %v369_v53, %v1330_v57  ;;  %v416_v18 = vmul.f32 %v415_v9, %v1330_v57 }
  0x9c   : > { %v353_v41 = vpop.permute.xlu1 %352  ;;  %v430_v42 = vpop.permute.xlu0 %429  ;;  %v374_v1 = vrot.slane %v370_v59, %v1228_v5  ;;  %v420_v29 = vrot.slane %v416_v18, %v1228_v5 }
  0x9d   : > { %v435_v14 = vrot.slane %v430_v42, %v1228_v5 }
  0x9f   : > { %v436_v21 = vmul.f32 %v435_v14, %v1325_v56 }
  0xa0   : > { %v322_v43 = vpop.permute.xlu1 %321 }
  0xa1   : > { %v399_v44 = vpop.permute.xlu0 %398  ;;  %v325_v2 = vsel %vm324_vm3, 0.0, %v322_v43  ;;  %v440_v30 = vrot.slane %v436_v21, %v1228_v5 }
  0xa2   : > { %v340_v10 = vmul.f32 %v339_v0, %v325_v2  ;;  %v401_v26 = vmul.f32 %v399_v44, %v1244_v13 }
  0xa4   : > { %v343_v45 = vpop.permute.xlu1 %342 }
  0xa5   : > { %v378_v46 = vpop.permute.xlu0 %377  ;;  %v346_v62 = vsel %vm345_vm2, 0.0, %v343_v45 }
  0xa6   : > { %v355_v6 = vmul.f32 %v353_v41, %v346_v62  ;;  %v381_v17 = vsel %vm380_vm5, 0.0, %v378_v46 }
  0xa7   : > { %v395_v22 = vmul.f32 %v394_v19, %v381_v17 }
  0xa8   : > { %v358_v47 = vpop.permute.xlu1 %357  ;;  %v356_v15 = vadd.f32 %v355_v6, %v340_v10 }
  0xa9   : > { %v450_v48 = vpop.permute.xlu0 %449  ;;  %v361_v3 = vsel %vm360_vm4, 0.0, %v358_v47 }
  0xaa   : > { %v375_v11 = vmul.f32 %v374_v1, %v361_v3 }
  0xac   : > { %v461_v49 = vpop.permute.xlu1 %460  ;;  %v376_v20 = vadd.f32 %v375_v11, %v356_v15 }
  0xad   : > { %v424_v50 = vpop.permute.xlu0 %423  ;;  %v466_v36 = vrot.slane %v461_v49, %v1228_v5 }
  0xae   : > { %v396_v27 = vadd.f32 %v395_v22, %v376_v20  ;;  %v427_v32 = vsel %vm426_vm7, %v424_v50, 0.0 }
  0xaf   : > { %v441_v37 = vmul.f32 %v440_v30, %v427_v32  ;;  %v467_v40 = vmul.f32 %v466_v36, %v1330_v57 }
  0xb0   : > { %v402_v33 = vadd.f32 %v401_v26, %v396_v27 }
  0xb1   : > { %v1318_v51 = vpop.permute.xlu1 %479  ;;  %v444_v54 = vpop.permute.xlu0 %443  ;;  %v471_v47 = vrot.slane %v467_v40, %v1228_v5 }
  0xb2   : > { %v447_v39 = vsel %vm446_vm8, %v444_v54, 0.0  ;;  %v485_v42 = vrot.slane %v1318_v51, %v1228_v5 }
  0xb3   : > { %v452_v41 = vmul.f32 %v450_v48, %v447_v39 }
  0xb4   : > { %v486_v46 = vmul.f32 %v485_v42, %v1325_v56 }
  0xb5   : > { %v404_v55 = vpop.permute.xlu1 %403  ;;  %v455_v61 = vpop.permute.xlu0 %454 }
  0xb6   : > { %v407_v24 = vsel %vm406_vm6, %v404_v55, 0.0  ;;  %v458_v45 = vsel %vm457_vm9, %v455_v61, 0.0  ;;  %v490_v58 = vrot.slane %v486_v46, %v1228_v5 }
  0xb7   : > { %v421_v31 = vmul.f32 %v420_v29, %v407_v24  ;;  %v472_v53 = vmul.f32 %v471_v47, %v458_v45 }
  0xb9   : > { %v1334_v60 = vpop.permute.xlu1 %508  ;;  %v475_v12 = vpop.permute.xlu0 %474  ;;  %v422_v38 = vadd.f32 %v421_v31, %v402_v33 }
  0xba   : > { %v514_v54 = vrot.slane %v1334_v60, %v1228_v5  ;;  %v477_v48 = vsel %vm324_vm3, 0.0, %v475_v12 }
  0xbb   : > { %v442_v43 = vadd.f32 %v441_v37, %v422_v38  ;;  %v491_v62 = vmul.f32 %v490_v58, %v477_v48 }
  0xbc   : > { %v515_v63 = vmul.f32 %v514_v54, %v1330_v57 }
  0xbd   : > { %v494_v23 = vpop.permute.xlu0 %493  ;;  %v453_v49 = vadd.f32 %v452_v41, %v442_v43 }
  0xbe   : > { %v1342_v4 = vpop.permute.xlu1 %527  ;;  %v496_v55 = vsel %vm345_vm2, 0.0, %v494_v23  ;;  %v519_v9 = vrot.slane %v515_v63, %v1228_v5 }
  0xbf   : > { %v473_v51 = vadd.f32 %v472_v53, %v453_v49  ;;  %v533_v59 = vrot.slane %v1342_v4, %v1228_v5 }
  0xc1   : > { %v504_v34 = vpop.permute.xlu0 %503  ;;  %v492_v2 = vadd.f32 %v491_v62, %v473_v51  ;;  %v534_v3 = vmul.f32 %v533_v59, %v1325_v56 }
  0xc2   : > { %v506_v6 = vsel %vm360_vm4, 0.0, %v504_v34 }
  0xc3   : > { %v499_v16 = vpop.permute.xlu1 %498  ;;  %v520_v12 = vmul.f32 %v519_v9, %v506_v6  ;;  %v538_v14 = vrot.slane %v534_v3, %v1228_v5 }
  0xc4   : > { %v501_v0 = vmul.f32 %v499_v16, %v496_v55 }
  0xc5   : > { %v523_v44 = vpop.permute.xlu0 %522 }
  0xc6   : > { %v502_v10 = vadd.f32 %v501_v0, %v492_v2  ;;  %v525_v4 = vsel %vm380_vm5, 0.0, %v523_v44 }
  0xc7   : > { %v539_v19 = vmul.f32 %v538_v14, %v525_v4 }
  0xc8   : > { %v553_v25 = vpop.permute.xlu1 %552  ;;  %v521_v18 = vadd.f32 %v520_v12, %v502_v10 }
  0xc9   : > { %v591_v50 = vpop.permute.xlu0 %590  ;;  %v558_v60 = vrot.slane %v553_v25, %v1228_v5 }
  0xca   : > { %v540_v25 = vadd.f32 %v539_v19, %v521_v18 }
  0xcb   : > { %v559_v15 = vmul.f32 %v558_v60, %v1330_v57 }
  0xcd   : > { %v572_v35 = vpop.permute.xlu1 %571  ;;  %v567_v1 = vpop.permute.xlu0 %566  ;;  %v563_v24 = vrot.slane %v559_v15, %v1228_v5 }
  0xce   : > { %v577_v16 = vrot.slane %v572_v35, %v1228_v5  ;;  %v569_v32 = vsel %vm426_vm7, %v567_v1, 0.0 }
  0xd0   : > { %v578_v21 = vmul.f32 %v577_v16, %v1325_v56 }
  0xd1   : > { %v586_v11 = vpop.permute.xlu0 %585 }
  0xd2   : > { %v543_v13 = vpop.permute.xlu1 %542  ;;  %v582_v29 = vrot.slane %v578_v21, %v1228_v5  ;;  %v588_v35 = vsel %vm446_vm8, %v586_v11, 0.0 }
  0xd3   : > { %v545_v22 = vmul.f32 %v543_v13, %v1233_v8  ;;  %v593_v39 = vmul.f32 %v591_v50, %v588_v35 }
  0xd4   : > { %v583_v37 = vmul.f32 %v582_v29, %v569_v32 }
  0xd5   : > { %v596_v23 = vpop.permute.xlu0 %595  ;;  %v546_v30 = vadd.f32 %v545_v22, %v540_v25 }
  0xd6   : > { %v598_v44 = vsel %vm457_vm9, %v596_v23, 0.0 }
  0xd7   : > { %v601_v52 = vpop.permute.xlu1 %600 }
  0xd8   : > { %v606_v31 = vrot.slane %v601_v52, %v1228_v5 }
  0xd9   : > { %v616_v34 = vpop.permute.xlu0 %615 }
  0xda   : > { %v607_v8 = vmul.f32 %v606_v31, %v1330_v57  ;;  %v618_v52 = vsel %vm324_vm3, 0.0, %v616_v34 }
  0xdc   : > { %v621_v61 = vpop.permute.xlu1 %620  ;;  %v611_v40 = vrot.slane %v607_v8, %v1228_v5 }
  0xdd   : > { %v626_v38 = vrot.slane %v621_v61, %v1228_v5  ;;  %v635_v42 = vpop.permute.xlu0 %634 }
  0xde   : > { %v612_v47 = vmul.f32 %v611_v40, %v598_v44  ;;  %v637_v53 = vsel %vm345_vm2, 0.0, %v635_v42 }
  0xdf   : > { %v627_v41 = vmul.f32 %v626_v38, %v1325_v56 }
  0xe0   : > { %v548_v7 = vpop.permute.xlu1 %547 }
  0xe1   : > { %v550_v20 = vsel %vm406_vm6, %v548_v7, 0.0  ;;  %v631_v49 = vrot.slane %v627_v41, %v1228_v5  ;;  %v645_v55 = vpop.permute.xlu0 %644 }
  0xe2   : > { %v564_v26 = vmul.f32 %v563_v24, %v550_v20  ;;  %v647_v1 = vsel %vm360_vm4, 0.0, %v645_v55 }
  0xe3   : > { %v632_v58 = vmul.f32 %v631_v49, %v618_v52 }
  0xe4   : > { %v650_v17 = vpop.permute.xlu1 %649  ;;  %v565_v33 = vadd.f32 %v564_v26, %v546_v30 }
  0xe5   : > { %v655_v46 = vrot.slane %v650_v17, %v1228_v5  ;;  %v664_v2 = vpop.permute.xlu0 %663 }
  0xe6   : > { %v584_v13 = vadd.f32 %v583_v37, %v565_v33  ;;  %v666_v9 = vsel %vm380_vm5, 0.0, %v664_v2 }
  0xe7   : > { %v656_v48 = vmul.f32 %v655_v46, %v1330_v57 }
  0xe8   : > { %v594_v45 = vadd.f32 %v593_v39, %v584_v13 }
  0xe9   : > { %v669_v27 = vpop.permute.xlu1 %668  ;;  %v660_v62 = vrot.slane %v656_v48, %v1228_v5  ;;  %v689_v15 = vpop.permute.xlu0 %688 }
  0xea   : > { %v613_v54 = vadd.f32 %v612_v47, %v594_v45  ;;  %v674_v51 = vrot.slane %v669_v27, %v1228_v5  ;;  %v691_v22 = vsel %vm406_vm6, %v689_v15, 0.0 }
  0xeb   : > { %v661_v6 = vmul.f32 %v660_v62, %v647_v1 }
  0xec   : > { %v633_v61 = vadd.f32 %v632_v58, %v613_v54  ;;  %v675_v63 = vmul.f32 %v674_v51, %v1325_v56 }
  0xed   : > { %v727_v24 = vpop.permute.xlu0 %726 }
  0xee   : > { %v640_v36 = vpop.permute.xlu1 %639  ;;  %v679_v7 = vrot.slane %v675_v63, %v1228_v5 }
  0xef   : > { %v642_v59 = vmul.f32 %v640_v36, %v637_v53 }
  0xf0   : > { %v680_v14 = vmul.f32 %v679_v7, %v666_v9 }
  0xf1   : > { %v643_v3 = vadd.f32 %v642_v59, %v633_v61 }
  0xf3   : > { %v694_v43 = vpop.permute.xlu1 %693  ;;  %v662_v11 = vadd.f32 %v661_v6, %v643_v3 }
  0xf4   : > { %v699_v60 = vrot.slane %v694_v43, %v1228_v5 }
  0xf5   : > { %v681_v19 = vadd.f32 %v680_v14, %v662_v11 }
  0xf6   : > { %v700_v4 = vmul.f32 %v699_v60, %v1330_v57 }
  0xf8   : > { %v713_v50 = vpop.permute.xlu1 %712  ;;  %v704_v17 = vrot.slane %v700_v4, %v1228_v5 }
  0xf9   : > { %v718_v12 = vrot.slane %v713_v50, %v1228_v5 }
  0xfa   : > { %v705_v25 = vmul.f32 %v704_v17, %v691_v22 }
  0xfb   : > { %v719_v18 = vmul.f32 %v718_v12, %v1325_v56 }
  0xfd   : > { %v684_v0 = vpop.permute.xlu1 %683  ;;  %v723_v27 = vrot.slane %v719_v18, %v1228_v5 }
  0xfe   : > { %v686_v16 = vmul.f32 %v684_v0, %v1288_v28  ;;  %v729_v28 = vsel %vm446_vm8, %v727_v24, 0.0 }
 0x100   : > { %v687_v23 = vadd.f32 %v686_v16, %v681_v19 }
 0x102   : > { %v742_v10 = vpop.permute.xlu1 %741  ;;  %v706_v56 = vadd.f32 %v705_v25, %v687_v23 }
 0x103   : > { %v747_v20 = vrot.slane %v742_v10, %v1228_v5 }
 0x105   : > { %v748_v26 = vmul.f32 %v747_v20, %v1330_v57 }
 0x107   : > { %v732_v21 = vpop.permute.xlu1 %731  ;;  %v752_v34 = vrot.slane %v748_v26, %v1228_v5 }
 0x108   : > { %v734_v32 = vmul.f32 %v732_v21, %v729_v28 }
 0x10b   : > { %v708_v29 = vpop.permute.xlu1 %707 }
 0x10c   : > { %v710_v30 = vsel %vm426_vm7, %v708_v29, 0.0 }
 0x10d   : > { %v724_v31 = vmul.f32 %v723_v27, %v710_v30 }
 0x10f   : > { %v725_v33 = vadd.f32 %v724_v31, %v706_v56  ;;  %v737_v35 = vpop.permute.xlu1 %736 }
 0x110   : > { %v739_v36 = vsel %vm457_vm9, %v737_v35, 0.0 }
 0x111   : > { %v735_v37 = vadd.f32 %v734_v32, %v725_v33  ;;  %v753_v8 = vmul.f32 %v752_v34, %v739_v36 }
 0x113   : > { %v754_v57 = vadd.f32 %v753_v8, %v735_v37 }
 0x115   : > { %v755_v38 = vpack.c.bf16 %v754_v57, %v754_v57 }
 0x117   : > { %757 = vst.msk [vmem:[%s292_s30] sm:$0xf] %vm756_vm10, %v755_v38  ;;  %v758_v39 = vunpack.c.l.bf16 %v755_v38 }
 0x119   : > { %v760_v13 = vsel %vm759_vm11, %v758_v39, 0.0  ;;  %v773_v40 = vmul.f32 %v758_v39, %v758_v39 }
 0x11a   : > { %761 = vadd.xlane.f32.xlu0 %v760_v13 }
 0x11b   : > { %v774_v5 = vsel %vm759_vm11, %v773_v40, 0.0 }
 0x11c   : > { %775 = vadd.xlane.f32.xlu1 %v774_v5 }
 0x1a7   : > { %v762_v41 = vpop.xlane.xlu0 %761 }
 0x1a8   : > { %v763_v42 = vrot.slane %v762_v41, 4 }
 0x1a9   : > { %v776_v43 = vpop.xlane.xlu1 %775 }
 0x1aa   : > { %v764_v44 = vadd.f32 %v763_v42, %v762_v41  ;;  %v777_v45 = vrot.slane %v776_v43, 4 }
 0x1ac   : > { %v765_v46 = vrot.slane %v764_v44, 2  ;;  %v778_v47 = vadd.f32 %v777_v45, %v776_v43 }
 0x1ae   : > { %v779_v49 = vrot.slane %v778_v47, 2  ;;  %v766_v52 = vadd.f32 %v765_v46, %v764_v44 }
 0x1b0   : > { %v780_v53 = vadd.f32 %v779_v49, %v778_v47  ;;  %v767_v50 = vrot.slane %v766_v52, 1 }
 0x1b2   : > { %v768_v54 = vadd.f32 %v767_v50, %v766_v52  ;;  %v781_v48 = vrot.slane %v780_v53, 1 }
 0x1b4   : > { %976 = vpush %v768_v54  ;;  %v782_v55 = vadd.f32 %v781_v48, %v780_v53 }
 0x1b6   : > { %978 = vpush %v782_v55 }
 0x1e5   : > { %s977_s9 = spop %976 }
 0x1e6   : > { %v770_v51 = vstv %s977_s9 }
 0x1e7   : > { %772 = vst.msk [vmem:[%s299_s8] sm:$0x1] %vm771_vm12, %v770_v51  ;;  %s979_s13 = spop %978 }
 0x1e8   : > { %v784_v58 = vstv %s979_s13 }
 0x1e9   : > { %785 = vst.msk [vmem:[%s306_s12] sm:$0x1] %vm771_vm12, %v784_v58 }
 0x1ea PF: > { %s16_s22 = sadd.s32 1, %s1121_s22   ;;  %s1451_s18 = smov %s1113_s20 }
 0x1eb   : > { %p13_p7 = scmp.ge.s32.totalorder %s16_s22, 18   ;;  %s1452_s19 = smov %s1117_s21 }
 0x1ec   : > { %s1453_s20 = smov %s1456_s23  ;;  %s1454_s21 = smov %s1460_s24 }
 0x1ed   :  { %15 = sbr.rel (!%p13_p7) target bundleno = 3 (0x3), region = 89 }

// kernel: mobilenet3d_block.4
= control target key start
LH: loop header
LB: loop body
LE: loop exit
PB: predicated region body
PF: predicated region fallthrough
CT: control target
= control target key end

     0   :  { %s586_s15 = smov 0   ;;  %s588_s16 = smov 0   ;;  %s632_s0 = inlined_call_operand.vmem [shape: bf16[2,8,512], index: 0, kind: input, shape index: {}]   ;;  %s633_s1 = inlined_call_operand.vmem [shape: f32[8,1], index: 1, kind: input, shape index: {}]   ;;  %s634_s2 = inlined_call_operand.vmem [shape: f32[8,1], index: 2, kind: input, shape index: {}]   ;;  %s635_s3 = inlined_call_operand.vmem [shape: f32[2,1,8,1], index: 3, kind: output, shape index: {0}]   ;;  %s636_s4 = inlined_call_operand.vmem [shape: f32[2,1,8,8], index: 4, kind: output, shape index: {1}]  }
   0x1   :  { %s590_s17 = smov 0  }
   0x2 LB: > { %s27_s18 = sadd.s32 1, %s554_s16  ;;  %p501_p0 = scmp.ge.s32.totalorder %s558_s17, 1  ;;  %s558_s17 = sphi %s590_s17, %s15_s17   ;;  %s554_s16 = sphi %s588_s16, %s638_s16   ;;  %s550_s15 = sphi %s586_s15, %s637_s15  }
   0x3   : > { %p29_p1 = scmp.ge.s32.totalorder %s27_s18, 2  ;;  %p188_p2 = scmp.lt.s32.totalorder %s558_s17, 3 }
   0x5   : > { %s640_s18 = smov (%p29_p1, %s27_s18), 0  ;;  %p189_p3 = pnand %p501_p0, %p188_p2 }
   0x6   : > { %v258_v0 = vld [vmem:[%s633_s1] sm:$0xff] (!%p189_p3)  ;;  %v560_v1 = vmov (!%p189_p3), 0   ;;  %p228_p4 = scmp.lt.s32.totalorder (!%p189_p3), %s550_s15, 1  ;;  %vm295_vm0 = vcmask (!%p189_p3), 7168   ;;  %vm377_vm1 = vcmask (!%p189_p3), 64512  }
   0x7   : > { %192 = sbr.rel (%p189_p3) target bundleno = 370 (0x172), region = 32  ;;  %535 = vset.pattern.permute.xlu0 (!%p189_p3), %v560_v1  ;;  %v268_v2 = vld [vmem:[%s634_s2] sm:$0xff] (!%p189_p3) }
   0x8   : > { %261 = vperm.xlu0 (!%p189_p3), %535, %v258_v0  }
   0xc   : > { %271 = vperm.xlu0 (!%p189_p3), %535, %v268_v2  }
   0xe   : > { %s642_s15 = smov (!%p228_p4, %s550_s15), 1 }
   0xf   : > { %s508_s23 = sshll.u32 %s642_s15, 4  ;;  %s504_s27 = sshll.u32 %s642_s15, 3 }
  0x10   : > { %s235_s26 = scalar_lea.vmem %s632_s0, %s508_s23  ;;  %s243_s30 = scalar_lea.vmem %s635_s3, %s504_s27 }
  0x11   : > { %v252_v3 = vld [vmem:[%s235_s26] sm:$0xff]  ;;  %v253_v4 = vld [vmem:[%s235_s26 + $0x8] sm:$0xff]  ;;  %s250_s7 = scalar_lea.vmem %s636_s4, %s504_s27 }
  0x12   : > { %v254_v5 = vunpack.c.l.bf16 %v252_v3  ;;  %v255_v6 = vunpack.c.h.bf16 %v252_v3  ;;  %v256_v7 = vunpack.c.l.bf16 %v253_v4  ;;  %v257_v8 = vunpack.c.h.bf16 %v253_v4 }
  0x87   : > { %v262_v9 = vpop.permute.xlu0 %261 }
  0x88   : > { %v264_v10 = vmul.f32 %v262_v9, %v254_v5  ;;  %v265_v11 = vmul.f32 %v262_v9, %v255_v6  ;;  %v266_v12 = vmul.f32 %v262_v9, %v256_v7  ;;  %v267_v13 = vmul.f32 %v262_v9, %v257_v8 }
  0x8b   : > { %v272_v14 = vpop.permute.xlu0 %271 }
  0x8c   : > { %v274_v15 = vadd.f32 %v272_v14, %v264_v10  ;;  %v275_v16 = vadd.f32 %v272_v14, %v265_v11  ;;  %v276_v17 = vadd.f32 %v272_v14, %v266_v12  ;;  %v277_v18 = vadd.f32 %v272_v14, %v267_v13 }
  0x8e   : > { %v278_v19 = vmax.f32 %v274_v15, 0.0  ;;  %v279_v20 = vmax.f32 %v275_v16, 0.0  ;;  %v280_v21 = vmax.f32 %v276_v17, 0.0  ;;  %v281_v22 = vmax.f32 %v277_v18, 0.0 }
  0x90   : > { %v283_v23 = vpack.c.bf16 %v279_v20, %v279_v20  ;;  %v285_v24 = vpack.c.bf16 %v281_v22, %v281_v22  ;;  %v282_v25 = vpack.c.bf16 %v278_v19, %v278_v19  ;;  %v284_v26 = vpack.c.bf16 %v280_v21, %v280_v21 }
  0x92   : > { %297 = vmatprep.subr.bf16.mxu1 %v283_v23  ;;  %329 = vmatprep.mubr.bf16.mxu1 %v283_v23  ;;  %v286_v27 = vunpack.c.l.bf16 %v282_v25  ;;  %v287_v28 = vunpack.c.l.bf16 %v283_v23  ;;  %v288_v29 = vunpack.c.l.bf16 %v284_v26  ;;  %v289_v31 = vunpack.c.l.bf16 %v285_v24 }
  0x93   : > { %337 = vmatprep.subr.bf16.mxu0 %v285_v24  ;;  %369 = vmatprep.mubr.bf16.mxu0 %v285_v24 }
  0x94   : > { %298 = vmatpush1.bf16.xpose.msra.mxu1 %v282_v25  ;;  %338 = vmatpush1.bf16.xpose.msra.mxu0 %v284_v26  ;;  %v290_v30 = vadd.f32 %v287_v28, %v286_v27 }
  0x96   : > { %v291_v32 = vadd.f32 %v290_v30, %v288_v29 }
  0x98   : > { %v292_v33 = vadd.f32 %v291_v32, %v289_v31 }
  0x9a   : > { %293 = vadd.xlane.f32.xlu1 %v292_v33 }
  0x9b   : > { %330 = vmatmul.mubr.bf16.vlgmr.msra.gmra.mrb[0].mxu1 %v282_v25  ;;  %370 = vmatmul.mubr.bf16.vlgmr.msra.gmra.mrb[0].mxu0 %v284_v26 }
 0x127   : > { %v294_v34 = vpop.xlane.xlu1 %293 }
 0x128   : > { %296 = vst.msk [vmem:[%s243_s30] sm:$0xff] %vm295_vm0, %v294_v34 }
 0x16e   : > { %v331_v35 = vpop.f32.mrb[0].mxu1  ;;  %v371_v36 = vpop.f32.mrb[0].mxu0 }
 0x16f   : > { %v372_v37 = vadd.f32 %v371_v36, %v331_v35  ;;  %v333_v38 = vpop.f32.mrb[1].mxu1  ;;  %v373_v39 = vpop.f32.mrb[1].mxu0 }
 0x170   : > { %v334_v40 = vpop.f32.mrb[2].mxu1  ;;  %v374_v41 = vpop.f32.mrb[2].mxu0 }
 0x171   : > { %378 = vst.msk [vmem:[%s250_s7] sm:$0xff] %vm377_vm1, %v372_v37  ;;  %v335_v42 = vpop.f32.mrb[3].mxu1  ;;  %v375_v43 = vpop.f32.mrb[3].mxu0 }
 0x172 PF: > { %s15_s17 = sadd.s32 1, %s558_s17   ;;  %s637_s15 = smov %s554_s16 }
 0x173   : > { %p12_p5 = scmp.ge.s32.totalorder %s15_s17, 4   ;;  %s638_s16 = smov %s640_s18 }
 0x175   :  { %14 = sbr.rel (!%p12_p5) target bundleno = 2 (0x2), region = 74 }

// kernel: mobilenet3d_block.5
= control target key start
LH: loop header
LB: loop body
LE: loop exit
PB: predicated region body
PF: predicated region fallthrough
CT: control target
= control target key end

     0   :  { %s685_s21 = smov 0   ;;  %s687_s22 = smov 0   ;;  %s743_s0 = inlined_call_operand.vmem [shape: bf16[2,8,512], index: 0, kind: input, shape index: {}]   ;;  %s744_s1 = inlined_call_operand.vmem [shape: f32[8,1], index: 1, kind: input, shape index: {}]   ;;  %s745_s2 = inlined_call_operand.vmem [shape: f32[8,1], index: 2, kind: input, shape index: {}]   ;;  %s746_s3 = inlined_call_operand.vmem [shape: bf16[16,8], index: 3, kind: input, shape index: {}]   ;;  %s747_s4 = inlined_call_operand.vmem [shape: f32[16,1], index: 4, kind: input, shape index: {}]   ;;  %s748_s5 = inlined_call_operand.vmem [shape: f32[16,1], index: 5, kind: input, shape index: {}]   ;;  %s749_s6 = inlined_call_operand.vmem [shape: f32[2,16,512], index: 6, kind: output, shape index: {}]  }
   0x1   :  { %s689_s23 = smov 0  }
   0x2 LB: > { %s28_s24 = sadd.s32 1, %s643_s22  ;;  %p583_p0 = scmp.ge.s32.totalorder %s647_s23, 1  ;;  %s647_s23 = sphi %s689_s23, %s16_s23   ;;  %s643_s22 = sphi %s687_s22, %s751_s22   ;;  %s639_s21 = sphi %s685_s21, %s750_s21  }
   0x3   : > { %p30_p1 = scmp.ge.s32.totalorder %s28_s24, 2  ;;  %p233_p2 = scmp.lt.s32.totalorder %s647_s23, 3 }
   0x5   : > { %s753_s24 = smov (%p30_p1, %s28_s24), 0  ;;  %p234_p3 = pnand %p583_p0, %p233_p2 }
   0x6   : > { %v298_v0 = vld [vmem:[%s744_s1] sm:$0xff] (!%p234_p3)  ;;  %v649_v1 = vmov (!%p234_p3), 0   ;;  %v437_v5 = vld [vmem:[%s747_s4 + $0x8] sm:$0xff] (!%p234_p3)  ;;  %p272_p4 = scmp.lt.s32.totalorder (!%p234_p3), %s639_s21, 1  ;;  %vm337_vm0 = vcmask (!%p234_p3), 1043456   ;;  %vm333_vm1 = vcmask (!%p234_p3), 64512  }
   0x7   : > { %237 = sbr.rel (%p234_p3) target bundleno = 372 (0x174), region = 44  ;;  %622 = vset.pattern.permute.xlu0 (!%p234_p3), %v649_v1  ;;  %382 = vmatprep.mubr.bf16.mxu0 (!%p234_p3), %v649_v1  ;;  %v308_v2 = vld [vmem:[%s745_s2] sm:$0xff] (!%p234_p3)  ;;  %v457_v6 = vld [vmem:[%s748_s5 + $0x8] sm:$0xff] (!%p234_p3) }
   0x8   : > { %301 = vperm.xlu0 (!%p234_p3), %622, %v298_v0   ;;  %425 = vmatprep.mubr.bf16.mxu1 (!%p234_p3), %v649_v1  ;;  %v456_v3 = vld [vmem:[%s748_s5] sm:$0xff] (!%p234_p3) }
   0x9   : > { %623 = vset.pattern.permute.xlu1 (!%p234_p3), %v649_v1  ;;  %v436_v4 = vld [vmem:[%s747_s4] sm:$0xff] (!%p234_p3) }
   0xa   : > { %440 = vperm.xlu1 (!%p234_p3), %623, %v436_v4   ;;  %v624_v33 = vld [vmem:[%s746_s3] sm:$0xff] (!%p234_p3)  }
   0xc   : > { %311 = vperm.xlu0 (!%p234_p3), %622, %v308_v2  }
   0xe   : > { %445 = vperm.xlu1 %623, %v437_v5   ;;  %s755_s21 = smov (!%p272_p4, %s639_s21), 1 }
   0xf   : > { %s595_s13 = sshll.u32 %s755_s21, 4  ;;  %s596_s19 = sshll.u32 %s755_s21, 6 }
  0x10   : > { %460 = vperm.xlu0 %622, %v456_v3   ;;  %s279_s16 = scalar_lea.vmem %s743_s0, %s595_s13  ;;  %s289_s26 = scalar_lea.vmem %s749_s6, %s596_s19 }
  0x11   : > { %v292_v7 = vld [vmem:[%s279_s16] sm:$0xff]  ;;  %v293_v8 = vld [vmem:[%s279_s16 + $0x8] sm:$0xff] }
  0x12   : > { %465 = vperm.xlu1 %623, %v457_v6   ;;  %v295_v9 = vunpack.c.h.bf16 %v292_v7  ;;  %v297_v10 = vunpack.c.h.bf16 %v293_v8  ;;  %v294_v11 = vunpack.c.l.bf16 %v292_v7  ;;  %v296_v12 = vunpack.c.l.bf16 %v293_v8 }
  0x87   : > { %v302_v13 = vpop.permute.xlu0 %301 }
  0x88   : > { %v305_v14 = vmul.f32 %v302_v13, %v295_v9  ;;  %v307_v15 = vmul.f32 %v302_v13, %v297_v10  ;;  %v304_v16 = vmul.f32 %v302_v13, %v294_v11  ;;  %v306_v17 = vmul.f32 %v302_v13, %v296_v12 }
  0x89   : > { %v441_v34 = vpop.permute.xlu1 %440 }
  0x8b   : > { %v312_v18 = vpop.permute.xlu0 %311 }
  0x8c   : > { %v315_v19 = vadd.f32 %v312_v18, %v305_v14  ;;  %v317_v20 = vadd.f32 %v312_v18, %v307_v15  ;;  %v314_v21 = vadd.f32 %v312_v18, %v304_v16  ;;  %v316_v22 = vadd.f32 %v312_v18, %v306_v17 }
  0x8d   : > { %v446_v35 = vpop.permute.xlu1 %445 }
  0x8e   : > { %v319_v23 = vmax.f32 %v315_v19, 0.0  ;;  %v321_v24 = vmax.f32 %v317_v20, 0.0  ;;  %v318_v25 = vmax.f32 %v314_v21, 0.0  ;;  %v320_v26 = vmax.f32 %v316_v22, 0.0 }
  0x8f   : > { %v461_v36 = vpop.permute.xlu0 %460 }
  0x90   : > { %v325_v27 = vpack.c.bf16 %v319_v23, %v319_v23  ;;  %v327_v28 = vpack.c.bf16 %v321_v24, %v321_v24  ;;  %v324_v29 = vpack.c.bf16 %v318_v25, %v318_v25  ;;  %v326_v30 = vpack.c.bf16 %v320_v26, %v320_v26 }
  0x91   : > { %v466_v53 = vpop.permute.xlu1 %465 }
  0x92   : > { %589 = vmatprep.subr.msk.bf16.mxu0 %vm337_vm0, %v325_v27  ;;  %591 = vmatprep.subr.msk.bf16.mxu1 %vm337_vm0, %v327_v28  ;;  %v339_v31 = vsel %vm337_vm0, %v324_v29, 0  ;;  %v345_v32 = vsel %vm337_vm0, %v326_v30, 0 }
  0x93   : > { %351 = vmatpush1.bf16.msra.mxu0 %v339_v31  ;;  %394 = vmatpush1.bf16.msra.mxu1 %v345_v32 }
  0x96   : > { %590 = vmatmul.mubr.msk.bf16.vlgmr.msra.gmra.mrb[0].mxu0 %vm333_vm1, %v624_v33  ;;  %592 = vmatmul.mubr.msk.bf16.vlgmr.msra.gmra.mrb[0].mxu1 %vm333_vm1, %v624_v33 }
 0x169   : > { %v384_v37 = vpop.f32.mrb[0].mxu0  ;;  %v427_v38 = vpop.f32.mrb[0].mxu1 }
 0x16a   : > { %v448_v39 = vmul.f32 %v441_v34, %v384_v37  ;;  %v450_v40 = vmul.f32 %v441_v34, %v427_v38  ;;  %v386_v41 = vpop.f32.mrb[1].mxu0  ;;  %v429_v42 = vpop.f32.mrb[1].mxu1 }
 0x16b   : > { %v449_v43 = vmul.f32 %v441_v34, %v386_v41  ;;  %v451_v44 = vmul.f32 %v441_v34, %v429_v42  ;;  %v388_v45 = vpop.f32.mrb[2].mxu0  ;;  %v431_v46 = vpop.f32.mrb[2].mxu1 }
 0x16c   : > { %v468_v47 = vadd.f32 %v461_v36, %v448_v39  ;;  %v470_v48 = vadd.f32 %v461_v36, %v450_v40  ;;  %v452_v49 = vmul.f32 %v446_v35, %v388_v45  ;;  %v454_v50 = vmul.f32 %v446_v35, %v431_v46  ;;  %v390_v51 = vpop.f32.mrb[3].mxu0  ;;  %v433_v52 = vpop.f32.mrb[3].mxu1 }
 0x16d   : > { %v469_v54 = vadd.f32 %v461_v36, %v449_v43  ;;  %v471_v55 = vadd.f32 %v461_v36, %v451_v44  ;;  %v453_v56 = vmul.f32 %v446_v35, %v390_v51  ;;  %v455_v57 = vmul.f32 %v446_v35, %v433_v52 }
 0x16e   : > { %v476_v58 = vmax.f32 %v468_v47, 0.0  ;;  %v478_v59 = vmax.f32 %v470_v48, 0.0  ;;  %v472_v60 = vadd.f32 %v466_v53, %v452_v49  ;;  %v474_v61 = vadd.f32 %v466_v53, %v454_v50 }
 0x16f   : > { %v477_v62 = vmax.f32 %v469_v54, 0.0  ;;  %v479_v63 = vmax.f32 %v471_v55, 0.0  ;;  %v473_v0 = vadd.f32 %v466_v53, %v453_v56  ;;  %v475_v1 = vadd.f32 %v466_v53, %v455_v57 }
 0x170   : > { %484 = vst [vmem:[%s289_s26] sm:$0xff] %v476_v58  ;;  %486 = vst [vmem:[%s289_s26 + $0x10] sm:$0xff] %v478_v59  ;;  %v480_v2 = vmax.f32 %v472_v60, 0.0  ;;  %v482_v3 = vmax.f32 %v474_v61, 0.0 }
 0x171   : > { %485 = vst [vmem:[%s289_s26 + $0x8] sm:$0xff] %v477_v62  ;;  %487 = vst [vmem:[%s289_s26 + $0x18] sm:$0xff] %v479_v63  ;;  %v481_v4 = vmax.f32 %v473_v0, 0.0  ;;  %v483_v5 = vmax.f32 %v475_v1, 0.0 }
 0x172   : > { %488 = vst [vmem:[%s289_s26 + $0x20] sm:$0xff] %v480_v2  ;;  %490 = vst [vmem:[%s289_s26 + $0x30] sm:$0xff] %v482_v3 }
 0x173   : > { %489 = vst [vmem:[%s289_s26 + $0x28] sm:$0xff] %v481_v4  ;;  %491 = vst [vmem:[%s289_s26 + $0x38] sm:$0xff] %v483_v5 }
 0x174 PF: > { %s16_s23 = sadd.s32 1, %s647_s23   ;;  %s750_s21 = smov %s643_s22 }
 0x175   : > { %p13_p5 = scmp.ge.s32.totalorder %s16_s23, 4   ;;  %s751_s22 = smov %s753_s24 }
 0x177   :  { %15 = sbr.rel (!%p13_p5) target bundleno = 2 (0x2), region = 74 }

</bundles_post_ra>
